<compile_context>
chip_gen: v6e
topology: v6e:2x2x1
jax: 0.10.0
libtpu: 0.0.40
codegen_flags: <defaults>
</compile_context>

<pallas_src>
import functools
import math

import numpy as np
import jax
import jax.numpy as jnp
from jax.experimental import pallas as pl
from jax.experimental.pallas import tpu as pltpu


# ----------------------------------------------------------------------------
# Pallas kernel 1: fused conv = sum of shifted matmuls + BN scale/bias
#                  (+ residual add) (+ ReLU), bf16 in / f32 accumulate.
# ----------------------------------------------------------------------------

def _choose_tn(cout):
    """Cout tile: >=2 parallel blocks for the large convs (v7x has 2 TCs)."""
    if cout >= 512 and cout % 256 == 0:
        return 256
    if cout % 128 == 0:
        return 128
    return cout


def _conv_kernel(x_ref, w_ref, s_ref, b_ref, *rest, offs, M, relu, has_res):
    """One Cout tile of: o = act((sum_t shift_t(x) @ w[t]) * scale + bias [+ res])."""
    if has_res:
        res_ref, o_ref = rest
    else:
        (o_ref,) = rest
    tn = o_ref.shape[-1]
    acc = jnp.zeros((M, tn), jnp.float32)
    for t, off in enumerate(offs):
        lhs = x_ref[0, off:off + M, :]                    # shifted window (VMEM slice)
        acc = acc + jnp.dot(lhs, w_ref[t], preferred_element_type=jnp.float32)
    y = acc * s_ref[...] + b_ref[...]
    if has_res:
        y = y + res_ref[0].astype(jnp.float32)
    if relu:
        y = jnp.maximum(y, 0.0)
    o_ref[0] = y.astype(o_ref.dtype)


def _conv_pallas(xf, w, scale, bias, res, *, offs, M, relu, out_dtype):
    """xf: (N, rows, K) bf16, w: (T, K, Cout) bf16, scale/bias: (1, Cout) f32,
    res: (N, M, Cout) bf16 or None -> (N, M, Cout) out_dtype."""
    N, rows, K = xf.shape
    T, _, cout = w.shape
    tn = _choose_tn(cout)
    nj = cout // tn

    in_specs = [
        pl.BlockSpec((1, rows, K), lambda n, j: (n, 0, 0)),
        pl.BlockSpec((T, K, tn), lambda n, j: (0, 0, j)),
        pl.BlockSpec((1, tn), lambda n, j: (0, j)),
        pl.BlockSpec((1, tn), lambda n, j: (0, j)),
    ]
    args = [xf, w, scale, bias]
    if res is not None:
        in_specs.append(pl.BlockSpec((1, M, tn), lambda n, j: (n, 0, j)))
        args.append(res)

    return pl.pallas_call(
        functools.partial(_conv_kernel, offs=offs, M=M, relu=relu,
                          has_res=res is not None),
        out_shape=jax.ShapeDtypeStruct((N, M, cout), out_dtype),
        grid_spec=pltpu.PrefetchScalarGridSpec(
            num_scalar_prefetch=0,
            grid=(N, nj),
            in_specs=in_specs,
            out_specs=pl.BlockSpec((1, M, tn), lambda n, j: (n, 0, j)),
        ),
        compiler_params=pltpu.CompilerParams(
            dimension_semantics=("parallel", "parallel")),
    )(*args)


def conv_op(x, p, *, relu, res=None, out_dtype=jnp.bfloat16):
    """Conv2d (+folded BN scale/bias) (+residual add) (+ReLU), NHWC bf16 in/out.

    Stride-1 convs use the no-im2col "wide row" formulation: the spatially
    padded activation is flattened to (Hp*Wp, Cin) and each tap (dy,dx) is a
    row-shifted matmul accumulated inside the kernel; the (kw-1) junk columns
    per output row are sliced off afterwards.
    """
    N, H, W, Cin = x.shape
    kh, kw, stride = p['kh'], p['kw'], p['stride']
    pad = (kh - 1) // 2
    cout = p['w'].shape[-1]
    x = x.astype(jnp.bfloat16)

    if stride == 1:
        Ho, Wo = H, W
        Hp, Wp = H + 2 * pad, W + 2 * pad
        xp = jnp.pad(x, ((0, 0), (pad, pad), (pad, pad), (0, 0)))
        xf = xp.reshape(N, Hp * Wp, Cin)
        if kw > 1:
            xf = jnp.pad(xf, ((0, 0), (0, kw - 1), (0, 0)))
        offs = tuple(dy * Wp + dx for dy in range(kh) for dx in range(kw))
        M = Ho * Wp
        res_f = None
        if res is not None:
            r = res.astype(jnp.bfloat16)
            if kw > 1:
                r = jnp.pad(r, ((0, 0), (0, 0), (0, kw - 1), (0, 0)))
            res_f = r.reshape(N, M, cout)
    else:
        # TODO(synk): the few stride-2 convs still build a (small, bf16) im2col
        # patch matrix in plain-JAX glue instead of in-kernel strided windows.
        Ho = (H + 2 * pad - kh) // stride + 1
        Wo = (W + 2 * pad - kw) // stride + 1
        xp = jnp.pad(x, ((0, 0), (pad, pad), (pad, pad), (0, 0)))
        cols = [xp[:, dy:dy + stride * Ho:stride, dx:dx + stride * Wo:stride, :]
                for dy in range(kh) for dx in range(kw)]
        patches = jnp.concatenate(cols, axis=-1)          # (N, Ho, Wo, kh*kw*Cin)
        xf = patches.reshape(N, Ho * Wo, kh * kw * Cin)
        offs = (0,)
        M = Ho * Wo
        Wp = Wo
        res_f = (res.astype(jnp.bfloat16).reshape(N, M, cout)
                 if res is not None else None)

    out = _conv_pallas(xf, p['w'], p['scale'], p['bias'], res_f,
                       offs=offs, M=M, relu=relu, out_dtype=out_dtype)
    out = out.reshape(N, Ho, Wp, cout)
    if Wp != Wo:
        out = out[:, :, :Wo, :]
    return out


# ----------------------------------------------------------------------------
# Pallas kernel 2: all four corner pools in one pass (no flips / transposes).
# Channel groups of the 512-ch input: [Top | Left | Bottom | Right] pools.
# ----------------------------------------------------------------------------

def _corner_pool4_kernel(x_ref, o_ref, *, C):
    _, H, W, _ = x_ref.shape
    # group 0: TopPool     out[i] = max_{k >= i} x[k]  (along H)
    carry = x_ref[:, H - 1:H, :, 0:C]
    o_ref[:, H - 1:H, :, 0:C] = carry
    for i in range(H - 2, -1, -1):
        carry = jnp.maximum(carry, x_ref[:, i:i + 1, :, 0:C])
        o_ref[:, i:i + 1, :, 0:C] = carry
    # group 2: BottomPool  out[i] = max_{k <= i} x[k]  (along H)
    carry = x_ref[:, 0:1, :, 2 * C:3 * C]
    o_ref[:, 0:1, :, 2 * C:3 * C] = carry
    for i in range(1, H):
        carry = jnp.maximum(carry, x_ref[:, i:i + 1, :, 2 * C:3 * C])
        o_ref[:, i:i + 1, :, 2 * C:3 * C] = carry
    # group 1: LeftPool    out[j] = max_{k >= j} x[k]  (along W)
    carry = x_ref[:, :, W - 1:W, C:2 * C]
    o_ref[:, :, W - 1:W, C:2 * C] = carry
    for j in range(W - 2, -1, -1):
        carry = jnp.maximum(carry, x_ref[:, :, j:j + 1, C:2 * C])
        o_ref[:, :, j:j + 1, C:2 * C] = carry
    # group 3: RightPool   out[j] = max_{k <= j} x[k]  (along W)
    carry = x_ref[:, :, 0:1, 3 * C:4 * C]
    o_ref[:, :, 0:1, 3 * C:4 * C] = carry
    for j in range(1, W):
        carry = jnp.maximum(carry, x_ref[:, :, j:j + 1, 3 * C:4 * C])
        o_ref[:, :, j:j + 1, 3 * C:4 * C] = carry


def corner_pool4(x, group_channels=128):
    N, H, W, C4 = x.shape
    return pl.pallas_call(
        functools.partial(_corner_pool4_kernel, C=group_channels),
        out_shape=jax.ShapeDtypeStruct(x.shape, x.dtype),
        grid=(N,),
        in_specs=[pl.BlockSpec((1, H, W, C4), lambda n: (n, 0, 0, 0))],
        out_specs=pl.BlockSpec((1, H, W, C4), lambda n: (n, 0, 0, 0)),
    )(x)


# ----------------------------------------------------------------------------
# Pallas kernel 3: out = a + nearest_upsample_2x(b), b at half resolution.
# ----------------------------------------------------------------------------

def _add_upsample2x_kernel(a_ref, b_ref, o_ref):
    _, h, w, C = b_ref.shape
    for j in range(w):
        bcol = b_ref[:, :, j:j + 1, :].astype(jnp.float32)        # (1, h, 1, C)
        rows = []
        for i in range(h):                                        # duplicate rows 2x
            r = bcol[:, i:i + 1, :, :]
            rows.append(r)
            rows.append(r)
        bcol2 = jnp.concatenate(rows, axis=1)                     # (1, 2h, 1, C)
        for dj in (0, 1):                                         # duplicate cols 2x
            col = 2 * j + dj
            o_ref[:, :, col:col + 1, :] = (
                a_ref[:, :, col:col + 1, :].astype(jnp.float32) + bcol2
            ).astype(o_ref.dtype)


def add_upsample2x(a, b):
    N, H2, W2, C = a.shape
    return pl.pallas_call(
        _add_upsample2x_kernel,
        out_shape=jax.ShapeDtypeStruct(a.shape, a.dtype),
        grid=(N,),
        in_specs=[pl.BlockSpec((1, H2, W2, C), lambda n: (n, 0, 0, 0)),
                  pl.BlockSpec((1, H2 // 2, W2 // 2, C), lambda n: (n, 0, 0, 0))],
        out_specs=pl.BlockSpec((1, H2, W2, C), lambda n: (n, 0, 0, 0)),
    )(a, b)


# ----------------------------------------------------------------------------
# Rotation glue (torchvision rotate ±45°, NEAREST, zero fill).
# ----------------------------------------------------------------------------

@functools.lru_cache(maxsize=None)
def _rotate_maps(H, W, angle_deg):
    a = math.radians(angle_deg)
    ii, jj = np.meshgrid(np.arange(H), np.arange(W), indexing='ij')
    cx, cy = (W - 1) / 2.0, (H - 1) / 2.0
    xd = jj - cx
    yd = ii - cy
    xs = math.cos(a) * xd - math.sin(a) * yd + cx
    ys = math.sin(a) * xd + math.cos(a) * yd + cy
    xi = np.rint(xs).astype(np.int32)
    yi = np.rint(ys).astype(np.int32)
    valid = (xi >= 0) & (xi < W) & (yi >= 0) & (yi < H)
    xi = np.clip(xi, 0, W - 1)
    yi = np.clip(yi, 0, H - 1)
    idx = (yi * W + xi).reshape(-1).astype(np.int32)
    return jnp.asarray(idx), jnp.asarray(valid.reshape(-1))


def rotate_nearest(x, angle_deg):
    # TODO(synk): gather stays in plain JAX (host-precomputed nearest map); exact
    # bit-match of torchvision's NEAREST pixel-center/rounding convention is not
    # guaranteed (possible one-pixel border differences).
    N, H, W, C = x.shape
    idx, valid = _rotate_maps(H, W, float(angle_deg))
    xf = x.reshape(N, H * W, C)
    g = jnp.take(xf, idx, axis=1)
    g = jnp.where(valid[None, :, None], g, jnp.zeros((), x.dtype))
    return g.reshape(N, H, W, C)


# ----------------------------------------------------------------------------
# Deterministic parameter init (eval-mode BN folded to scale/bias, bf16 weights
# stored in kernel-ready layout, merged convs pre-concatenated).
# ----------------------------------------------------------------------------

_rng = np.random.default_rng(0)


def _conv_weight(kh, kw, cin, cout):
    fan_in = kh * kw * cin
    w = _rng.normal(0.0, 1.0 / math.sqrt(fan_in), size=(kh, kw, cin, cout))
    return w.astype(np.float32)


def _fold_bn(cout, conv_bias=None, eps=1e-5):
    gamma = _rng.uniform(0.5, 1.5, cout)
    beta = _rng.normal(0.0, 0.1, cout)
    mean = _rng.normal(0.0, 0.1, cout)
    var = _rng.uniform(0.5, 1.5, cout)
    inv = gamma / np.sqrt(var + eps)
    cb = np.zeros(cout) if conv_bias is None else conv_bias
    return inv.astype(np.float32), ((cb - mean) * inv + beta).astype(np.float32)


def _plain_bias(cout, with_bias=True):
    scale = np.ones(cout, np.float32)
    bias = (_rng.normal(0.0, 0.01, cout) if with_bias
            else np.zeros(cout)).astype(np.float32)
    return scale, bias


def _pack_conv(w, scale, bias, stride):
    kh, kw, cin, cout = w.shape
    if stride == 1:
        wk = w.reshape(kh * kw, cin, cout)          # per-tap weights
    else:
        wk = w.reshape(1, kh * kw * cin, cout)      # im2col path
    return dict(w=jnp.asarray(wk, jnp.bfloat16),
                scale=jnp.asarray(scale.reshape(1, -1), jnp.float32),
                bias=jnp.asarray(bias.reshape(1, -1), jnp.float32),
                kh=kh, kw=kw, stride=stride)


def init_convolution(k, inp_dim, out_dim, stride=1, with_bn=True):
    w = _conv_weight(k, k, inp_dim, out_dim)
    if with_bn:
        scale, bias = _fold_bn(out_dim)
    else:
        scale, bias = _plain_bias(out_dim, with_bias=True)
    return _pack_conv(w, scale, bias, stride)


def init_conv_bn(k, inp_dim, out_dim, stride=1):
    w = _conv_weight(k, k, inp_dim, out_dim)
    scale, bias = _fold_bn(out_dim)
    return _pack_conv(w, scale, bias, stride)


def init_residual(inp_dim, out_dim, stride=1):
    return dict(
        conv1=init_conv_bn(3, inp_dim, out_dim, stride=stride),
        conv2=init_conv_bn(3, out_dim, out_dim),
        skip=(init_conv_bn(1, inp_dim, out_dim, stride=stride)
              if (stride != 1 or inp_dim != out_dim) else None),
    )


def apply_residual(r, x):
    y = conv_op(x, r['conv1'], relu=True)
    skip = x if r['skip'] is None else conv_op(x, r['skip'], relu=False)
    return conv_op(y, r['conv2'], relu=True, res=skip)   # bn2 + skip then ReLU, fused


def init_make_layer(k, inp_dim, out_dim, modules, stride=1):
    layers = [init_residual(inp_dim, out_dim, stride=stride)]
    layers += [init_residual(out_dim, out_dim) for _ in range(modules - 1)]
    return layers


def init_make_layer_revr(k, inp_dim, out_dim, modules):
    layers = [init_residual(inp_dim, inp_dim) for _ in range(modules - 1)]
    layers.append(init_residual(inp_dim, out_dim))
    return layers


def apply_residual_seq(layers, x):
    for r in layers:
        x = apply_residual(r, x)
    return x


def init_kp_module(n, dims, modules):
    curr_mod, next_mod = modules[0], modules[1]
    curr_dim, next_dim = dims[0], dims[1]
    p = dict(
        top=init_make_layer(3, curr_dim, curr_dim, curr_mod),
        low1=init_make_layer(3, curr_dim, next_dim, curr_mod, stride=2),
        low3=init_make_layer_revr(3, next_dim, curr_dim, curr_mod),
    )
    if n > 1:
        p['low2_kp'] = init_kp_module(n - 1, dims[1:], modules[1:])
    else:
        p['low2_seq'] = init_make_layer(3, next_dim, next_dim, next_mod)
    return p


def apply_kp_module(p, x):
    low1 = apply_residual_seq(p['low1'], x)           # self.down is identity
    if 'low2_kp' in p:
        low2 = apply_kp_module(p['low2_kp'], low1)
    else:
        low2 = apply_residual_seq(p['low2_seq'], low1)
    low3 = apply_residual_seq(p['low3'], low2)
    up1 = apply_residual_seq(p['top'], x)
    return add_upsample2x(up1, low3)                  # up1 + Upsample(low3), fused


def init_crosspool(dim):
    # Merge the four 3x3 dim->128 pre-pool convs (same input xr) into one
    # dim->512 conv; channel groups [p1|p2|p3|p4] feed Top/Left/Bottom/Right.
    ws, ss, bs = [], [], []
    for _ in range(4):
        w = _conv_weight(3, 3, dim, 128)
        s, b = _fold_bn(128)
        ws.append(w); ss.append(s); bs.append(b)
    p_all = _pack_conv(np.concatenate(ws, axis=3),
                       np.concatenate(ss), np.concatenate(bs), 1)

    # p_conv1 acts on the SUM of the four pools; by linearity this equals a
    # 3x3 512->dim conv with the 128->dim weight tiled 4x along Cin, which
    # removes the explicit 4-way pool add entirely.
    w_p = _conv_weight(3, 3, 128, dim)
    s_p, b_p = _fold_bn(dim)                          # folded p_bn1
    p_conv1 = _pack_conv(np.concatenate([w_p] * 4, axis=2), s_p, b_p, 1)

    return dict(
        p_all=p_all,
        p_conv1=p_conv1,
        conv1=init_conv_bn(1, dim, dim),              # conv1 + bn1 folded
        conv2=init_convolution(3, dim, dim),
    )


def apply_crosspool(p, x):
    xr = rotate_nearest(x, 45.0)
    pall = conv_op(xr, p['p_all'], relu=True)         # merged p1..p4_conv1 (+bn+relu)
    pooled = corner_pool4(pall)                       # Top/Left/Bottom/Right pools
    pooled = rotate_nearest(pooled, -45.0)
    bn1 = conv_op(x, p['conv1'], relu=False)
    mid = conv_op(pooled, p['p_conv1'], relu=True, res=bn1)   # relu(p_bn1 + bn1), fused
    return conv_op(mid, p['conv2'], relu=True)


def init_heads(cnv_dim, curr_dim, ncls):
    # Merge the three head stems (convolution(3, cnv_dim, curr_dim, with_bn=False))
    # into one 3x3 cnv_dim->3*curr_dim conv, and the three 1x1 output convs into
    # one block-diagonal 3*curr_dim -> (ncls+1+2) conv.
    ws, ss, bs = [], [], []
    for _ in range(3):
        w = _conv_weight(3, 3, cnv_dim, curr_dim)
        s, b = _plain_bias(curr_dim, with_bias=True)
        ws.append(w); ss.append(s); bs.append(b)
    c0 = _pack_conv(np.concatenate(ws, axis=3),
                    np.concatenate(ss), np.concatenate(bs), 1)

    out_dims = (ncls, 1, 2)
    n_out = sum(out_dims)
    w1 = np.zeros((1, 1, 3 * curr_dim, n_out), np.float32)
    b1 = np.zeros(n_out, np.float32)
    off = 0
    for i, od in enumerate(out_dims):
        w = _conv_weight(1, 1, curr_dim, od)
        _, b = _plain_bias(od, with_bias=True)
        w1[0, 0, i * curr_dim:(i + 1) * curr_dim, off:off + od] = w[0, 0]
        b1[off:off + od] = b
        off += od
    c1 = _pack_conv(w1, np.ones(n_out, np.float32), b1, 1)
    return dict(c0=c0, c1=c1, out_dims=out_dims)


def apply_heads(p, x):
    t = conv_op(x, p['c0'], relu=True)
    o = conv_op(t, p['c1'], relu=False, out_dtype=jnp.float32)
    ncls, ne, nr = p['out_dims']
    return (o[..., :ncls], o[..., ncls:ncls + ne],
            o[..., ncls + ne:ncls + ne + nr])


# ----------------------------------------------------------------------------
# CrossPoolNet
# ----------------------------------------------------------------------------

def init_crosspoolnet():
    nstack = 2
    nblk = 3
    ncls = 5
    cnv_dim = 256
    dims = [256, 256, 384, 384, 384, 512]
    curr_dim = dims[0]
    modules = [2, 2, 2, 4]
    P = dict(nstack=nstack)
    P['pre'] = dict(conv=init_convolution(7, 3, 128, stride=2),
                    res=init_residual(128, curr_dim, stride=2))
    P['kps'] = [init_kp_module(nblk, dims, modules) for _ in range(nstack)]
    P['cnvs'] = [init_convolution(3, curr_dim, cnv_dim) for _ in range(nstack)]
    P['inters'] = [init_residual(curr_dim, curr_dim) for _ in range(nstack - 1)]
    P['inters_'] = [init_conv_bn(1, curr_dim, curr_dim) for _ in range(nstack - 1)]
    P['cnvs_'] = [init_conv_bn(1, cnv_dim, curr_dim) for _ in range(nstack - 1)]
    P['cnvs_pool'] = [init_crosspool(cnv_dim) for _ in range(nstack)]
    P['heads'] = [init_heads(cnv_dim, curr_dim, ncls) for _ in range(nstack)]
    return P


def crosspoolnet_forward(P, inputs_nchw, point_list_, split, sz, training=False):
    del split, sz  # unused by the PyTorch forward as well
    x = jnp.transpose(inputs_nchw, (0, 2, 3, 1)).astype(jnp.bfloat16)  # NCHW -> NHWC
    inter = conv_op(x, P['pre']['conv'], relu=True)
    inter = apply_residual(P['pre']['res'], inter)

    outs = []
    nstack = P['nstack']
    for ind in range(nstack):
        kp = apply_kp_module(P['kps'][ind], inter)
        cnv = conv_op(kp, P['cnvs'][ind], relu=True)
        if ind < nstack - 1:
            inter_a = conv_op(inter, P['inters_'][ind], relu=False)
            # relu(inters_(inter) + cnvs_(cnv)) fused into the cnvs_ conv epilogue
            inter = conv_op(cnv, P['cnvs_'][ind], relu=True, res=inter_a)
            inter = apply_residual(P['inters'][ind], inter)
        if training or ind == nstack - 1:
            cnv_pool = apply_crosspool(P['cnvs_pool'][ind], cnv)
            hmap_, embd_, regs_ = apply_heads(P['heads'][ind], cnv_pool)
            outs.append([jnp.transpose(hmap_, (0, 3, 1, 2)),   # back to NCHW
                         jnp.transpose(embd_, (0, 3, 1, 2)),
                         jnp.transpose(regs_, (0, 3, 1, 2))])
    return {'type': 'poolNet', 'op': outs, 'pnl': point_list_}


# ----------------------------------------------------------------------------

if __name__ == "__main__":
    key = jax.random.PRNGKey(0)
    k_in, k_pnl = jax.random.split(key)

    # batch=1, RGB, 64x64 (divisible by 4 * 2^nblk = 32).
    inputs = jax.random.normal(k_in, (1, 3, 64, 64), dtype=jnp.float32)       # NCHW
    point_list_ = jax.random.normal(k_pnl, (1, 8, 2), dtype=jnp.float32)
    split = 1
    sz = (64, 64)

    params = init_crosspoolnet()
    out = crosspoolnet_forward(params, inputs, point_list_, split, sz, training=False)

    jax.block_until_ready(out['op'])

    hmap_, embd_, regs_ = out['op'][-1]
    assert hmap_.shape == (1, 5, 16, 16), hmap_.shape
    assert embd_.shape == (1, 1, 16, 16), embd_.shape
    assert regs_.shape == (1, 2, 16, 16), regs_.shape
    assert out['type'] == 'poolNet' and len(out['op']) == 1

    print("KERNEL_OK")
</pallas_src>

<mosaic_0001>
module attributes {stable_mosaic.version = 11 : i64} {
  func.func @_conv_kernel(%arg0: i32, %arg1: i32, %arg2: memref<1x1024x147xbf16, #tpu.memory_space<vmem>>, %arg3: memref<1x147x128xbf16, #tpu.memory_space<vmem>>, %arg4: memref<1x128xf32, #tpu.memory_space<vmem>>, %arg5: memref<1x128xf32, #tpu.memory_space<vmem>>, %arg6: memref<1x1024x128xbf16, #tpu.memory_space<vmem>>) attributes {dimension_semantics = [#tpu.dimension_semantics<parallel>, #tpu.dimension_semantics<parallel>], iteration_bounds = array<i64: 1, 1>, scalar_prefetch = 0 : i64, scratch_operands = 0 : i64, tpu.core_type = #tpu.core_type<tc>, window_params = [{transform_indices = @transform_0, window_bounds = array<i64: 1, 1024, 147>}, {transform_indices = @transform_1, window_bounds = array<i64: 1, 147, 128>}, {transform_indices = @transform_2, window_bounds = array<i64: 1, 128>}, {transform_indices = @transform_3, window_bounds = array<i64: 1, 128>}, {transform_indices = @transform_4, window_bounds = array<i64: 1, 1024, 128>}]} {
    %cst = arith.constant 0.000000e+00 : f32
    %0 = vector.broadcast %cst : f32 to vector<1024x128xf32>
    %c0 = arith.constant 0 : index
    %c0_0 = arith.constant 0 : index
    %c0_1 = arith.constant 0 : index
    %1 = vector.load %arg2[%c0, %c0_0, %c0_1] : memref<1x1024x147xbf16, #tpu.memory_space<vmem>>, vector<1x1024x147xbf16>
    %2 = vector.shape_cast %1 : vector<1x1024x147xbf16> to vector<1024x147xbf16>
    %c0_2 = arith.constant 0 : index
    %c0_3 = arith.constant 0 : index
    %c0_4 = arith.constant 0 : index
    %3 = vector.load %arg3[%c0_2, %c0_3, %c0_4] : memref<1x147x128xbf16, #tpu.memory_space<vmem>>, vector<1x147x128xbf16>
    %4 = vector.shape_cast %3 : vector<1x147x128xbf16> to vector<147x128xbf16>
    %cst_5 = arith.constant dense<0.000000e+00> : vector<1024x128xf32>
    %5 = tpu.matmul %2, %4, %cst_5 {dimension_numbers = #tpu.dot_dimension_numbers<[1], [0], [0], [1], [0, 0, 1, 1], [], []>} : vector<1024x147xbf16>, vector<147x128xbf16>, vector<1024x128xf32> -> vector<1024x128xf32>
    %6 = arith.addf %0, %5 : vector<1024x128xf32>
    %c0_6 = arith.constant 0 : index
    %c0_7 = arith.constant 0 : index
    %7 = vector.load %arg4[%c0_6, %c0_7] : memref<1x128xf32, #tpu.memory_space<vmem>>, vector<1x128xf32>
    %8 = vector.broadcast %7 : vector<1x128xf32> to vector<1024x128xf32>
    %9 = arith.mulf %6, %8 : vector<1024x128xf32>
    %c0_8 = arith.constant 0 : index
    %c0_9 = arith.constant 0 : index
    %10 = vector.load %arg5[%c0_8, %c0_9] : memref<1x128xf32, #tpu.memory_space<vmem>>, vector<1x128xf32>
    %11 = vector.broadcast %10 : vector<1x128xf32> to vector<1024x128xf32>
    %12 = arith.addf %9, %11 : vector<1024x128xf32>
    %cst_10 = arith.constant 0.000000e+00 : f32
    %13 = vector.broadcast %cst_10 : f32 to vector<1024x128xf32>
    %14 = arith.maximumf %12, %13 : vector<1024x128xf32>
    %15 = arith.truncf %14 : vector<1024x128xf32> to vector<1024x128xbf16>
    %c0_11 = arith.constant 0 : index
    %c0_12 = arith.constant 0 : index
    %c0_13 = arith.constant 0 : index
    %16 = vector.load %arg6[%c0_11, %c0_12, %c0_13] : memref<1x1024x128xbf16, #tpu.memory_space<vmem>>, vector<1x1024x128xbf16>
    %17 = vector.shape_cast %16 : vector<1x1024x128xbf16> to vector<1024x128xbf16>
    %18 = vector.shape_cast %15 : vector<1024x128xbf16> to vector<1x1024x128xbf16>
    tpu.vector_store %arg6[%c0_11, %c0_12, %c0_13], %18 {strides = array<i32>} : memref<1x1024x128xbf16, #tpu.memory_space<vmem>>, vector<1x1024x128xbf16>,
    return
  }
  func.func @transform_0(%arg0: i32, %arg1: i32) -> (i32, i32, i32) {
    %c0_i32 = arith.constant 0 : i32
    %c0_i32_0 = arith.constant 0 : i32
    %c0_i32_1 = arith.constant 0 : i32
    return %arg0, %c0_i32, %c0_i32_0 : i32, i32, i32
  }
  func.func @transform_1(%arg0: i32, %arg1: i32) -> (i32, i32, i32) {
    %c0_i32 = arith.constant 0 : i32
    %c0_i32_0 = arith.constant 0 : i32
    %c0_i32_1 = arith.constant 0 : i32
    return %c0_i32, %c0_i32_0, %arg1 : i32, i32, i32
  }
  func.func @transform_2(%arg0: i32, %arg1: i32) -> (i32, i32) {
    %c0_i32 = arith.constant 0 : i32
    %c0_i32_0 = arith.constant 0 : i32
    return %c0_i32, %arg1 : i32, i32
  }
  func.func @transform_3(%arg0: i32, %arg1: i32) -> (i32, i32) {
    %c0_i32 = arith.constant 0 : i32
    %c0_i32_0 = arith.constant 0 : i32
    return %c0_i32, %arg1 : i32, i32
  }
  func.func @transform_4(%arg0: i32, %arg1: i32) -> (i32, i32, i32) {
    %c0_i32 = arith.constant 0 : i32
    %c0_i32_0 = arith.constant 0 : i32
    return %arg0, %c0_i32, %arg1 : i32, i32, i32
  }
}

</mosaic_0001>

<bundles_post_ra>
// kernel: tpu_custom_call.1
= control target key start
LH: loop header
LB: loop body
LE: loop exit
PB: predicated region body
PF: predicated region fallthrough
CT: control target
= control target key end

     0   :  { %v3692_v1 = vmov 0   ;;  %vm799_vm0 = vcmask 154624   ;;  %vm992_vm1 = vcmask 1040384   ;;  %vm993_vm2 = vcmask 1041408   ;;  %s4479_s0 = inlined_call_operand.vmem [shape: bf16[1,1024,147], index: 0, kind: input, shape index: {}]   ;;  %s4480_s1 = inlined_call_operand.vmem [shape: bf16[1,147,128], index: 1, kind: input, shape index: {}]   ;;  %s4481_s2 = inlined_call_operand.vmem [shape: f32[1,128], index: 2, kind: input, shape index: {}]   ;;  %s4482_s3 = inlined_call_operand.vmem [shape: f32[1,128], index: 3, kind: input, shape index: {}]   ;;  %s4483_s4 = inlined_call_operand.hbm [shape: bf16[1,1024,128], index: 4, kind: output, shape index: {}]  }
   0x1   :  { %v3466_v0 = vld [vmem:[%s4480_s1 + $0x38] sm:$0xff]   ;;  %999 = vmatprep.subr.bf16.mxu0 %v3692_v1  ;;  %3441 = vmatprep.subr.bf16.mxu1 %v3692_v1  ;;  %v3467_v2 = vld [vmem:[%s4480_s1 + $0x30] sm:$0xff]   ;;  %v3468_v3 = vld [vmem:[%s4480_s1 + $0x28] sm:$0xff]   ;;  %v3693_v10 = vmov 65535  }
   0x2   :  { %1000 = vmatpush1.bf16.msra.mxu0 %v3466_v0  ;;  %3451 = vmatpush1.bf16.msra.mxu1 %v3466_v0  ;;  %v3469_v4 = vld [vmem:[%s4480_s1 + $0x20] sm:$0xff]   ;;  %v3470_v7 = vld [vmem:[%s4480_s1 + $0x18] sm:$0xff]   ;;  %v3471_v8 = vld [vmem:[%s4480_s1 + $0x10] sm:$0xff]   ;;  %v994_v11 = vsel %vm992_vm1, 4294967295, %v3693_v10 }
   0x3   :  { %1001 = vmatprep.subr.bf16.mxu0 %v3692_v1  ;;  %3442 = vmatprep.subr.bf16.mxu1 %v3692_v1  ;;  %v3478_v5 = vld [vmem:[%s4479_s0 + $0x4] ss:$8 sps:$4 sm:$0xff]   ;;  %v3474_v13 = vld [vmem:[%s4480_s1 + $0x48] ss:$0 sps:$4 sm:$0x33]   ;;  %v995_v14 = vsel %vm993_vm2, %v994_v11, 0 }
   0x4   :  { %2736 = vmatprep.mubr.msk.bf16.mxu0 %vm799_vm0, %v3478_v5  ;;  %v3481_v6 = vld [vmem:[%s4479_s0 + $0x204] ss:$8 sps:$4 sm:$0xff]   ;;  %v997_v15 = vand.u32 %v3474_v13, %v995_v14  ;;  %v3476_v17 = vld [vmem:[%s4479_s0] ss:$8 sps:$4 sm:$0xff]   ;;  %v3482_v19 = vld [vmem:[%s4479_s0 + $0x14] ss:$8 sps:$4 sm:$0xff]  }
   0x5   :  { %2768 = vmatprep.mubr.msk.bf16.mxu1 %vm799_vm0, %v3481_v6  ;;  %v3472_v9 = vld [vmem:[%s4480_s1 + $0x8] sm:$0xff]   ;;  %v3473_v12 = vld [vmem:[%s4480_s1] sm:$0xff]   ;;  %v3484_v20 = vld [vmem:[%s4479_s0 + $0x214] ss:$8 sps:$4 sm:$0xff]  }
   0x6   :  { %1002 = vmatpush1.bf16.msra.mxu0 %v3467_v2  ;;  %3452 = vmatpush1.bf16.msra.mxu1 %v3467_v2  ;;  %v3475_v16 = vld [vmem:[%s4480_s1 + $0x40] sm:$0xff]   ;;  %v3486_v21 = vld [vmem:[%s4479_s0 + $0x10] ss:$8 sps:$4 sm:$0xff]   ;;  %v3494_v27 = vld [vmem:[%s4479_s0 + $0x34] ss:$8 sps:$4 sm:$0xff]  }
   0x7   :  { %1003 = vmatprep.subr.bf16.mxu0 %v3692_v1  ;;  %3443 = vmatprep.subr.bf16.mxu1 %v3692_v1  ;;  %v3479_v18 = vld [vmem:[%s4479_s0 + $0x200] ss:$8 sps:$4 sm:$0xff]   ;;  %v3487_v22 = vld [vmem:[%s4479_s0 + $0x210] ss:$8 sps:$4 sm:$0xff]   ;;  %v3488_v23 = vld [vmem:[%s4479_s0 + $0x24] ss:$8 sps:$4 sm:$0xff]  }
   0x8   :  { %v3490_v24 = vld [vmem:[%s4479_s0 + $0x224] ss:$8 sps:$4 sm:$0xff]   ;;  %v3492_v25 = vld [vmem:[%s4479_s0 + $0x20] ss:$8 sps:$4 sm:$0xff]   ;;  %v3496_v28 = vld [vmem:[%s4479_s0 + $0x234] ss:$8 sps:$4 sm:$0xff]  }
   0x9   :  { %v3493_v26 = vld [vmem:[%s4479_s0 + $0x220] ss:$8 sps:$4 sm:$0xff]   ;;  %v3498_v29 = vld [vmem:[%s4479_s0 + $0x30] ss:$8 sps:$4 sm:$0xff]   ;;  %v3500_v31 = vld [vmem:[%s4479_s0 + $0x44] ss:$8 sps:$4 sm:$0xff]  }
   0xa   :  { %1004 = vmatpush1.bf16.msra.mxu0 %v3468_v3  ;;  %3453 = vmatpush1.bf16.msra.mxu1 %v3468_v3  ;;  %v3499_v30 = vld [vmem:[%s4479_s0 + $0x230] ss:$8 sps:$4 sm:$0xff]   ;;  %v3502_v32 = vld [vmem:[%s4479_s0 + $0x244] ss:$8 sps:$4 sm:$0xff]   ;;  %v3504_v33 = vld [vmem:[%s4479_s0 + $0x40] ss:$8 sps:$4 sm:$0xff]  }
   0xb   :  { %1005 = vmatprep.subr.bf16.mxu0 %v3692_v1  ;;  %3444 = vmatprep.subr.bf16.mxu1 %v3692_v1  ;;  %v3505_v34 = vld [vmem:[%s4479_s0 + $0x240] ss:$8 sps:$4 sm:$0xff]   ;;  %v3506_v35 = vld [vmem:[%s4479_s0 + $0x54] ss:$8 sps:$4 sm:$0xff]   ;;  %v3510_v37 = vld [vmem:[%s4479_s0 + $0x50] ss:$8 sps:$4 sm:$0xff]  }
   0xc   :  { %v3508_v36 = vld [vmem:[%s4479_s0 + $0x254] ss:$8 sps:$4 sm:$0xff]   ;;  %v3511_v38 = vld [vmem:[%s4479_s0 + $0x250] ss:$8 sps:$4 sm:$0xff]   ;;  %v3512_v39 = vld [vmem:[%s4479_s0 + $0x64] ss:$8 sps:$4 sm:$0xff]  }
   0xd   :  { %v3514_v40 = vld [vmem:[%s4479_s0 + $0x264] ss:$8 sps:$4 sm:$0xff]  }
   0xe   :  { %1006 = vmatpush1.bf16.msra.mxu0 %v3469_v4  ;;  %3454 = vmatpush1.bf16.msra.mxu1 %v3469_v4 }
   0xf   :  { %1007 = vmatprep.subr.bf16.mxu0 %v3692_v1  ;;  %3445 = vmatprep.subr.bf16.mxu1 %v3692_v1 }
  0x12   :  { %1008 = vmatpush1.bf16.msra.mxu0 %v3470_v7  ;;  %3455 = vmatpush1.bf16.msra.mxu1 %v3470_v7 }
  0x13   :  { %1009 = vmatprep.subr.bf16.mxu0 %v3692_v1  ;;  %3446 = vmatprep.subr.bf16.mxu1 %v3692_v1 }
  0x16   :  { %1010 = vmatpush1.bf16.msra.mxu0 %v3471_v8  ;;  %3456 = vmatpush1.bf16.msra.mxu1 %v3471_v8 }
  0x17   :  { %1011 = vmatprep.subr.bf16.mxu0 %v3692_v1  ;;  %3447 = vmatprep.subr.bf16.mxu1 %v3692_v1 }
  0x1a   :  { %1012 = vmatpush1.bf16.msra.mxu0 %v3472_v9  ;;  %3457 = vmatpush1.bf16.msra.mxu1 %v3472_v9 }
  0x1b   :  { %1013 = vmatprep.subr.bf16.mxu0 %v3692_v1  ;;  %3448 = vmatprep.subr.bf16.mxu1 %v3692_v1 }
  0x1e   :  { %1014 = vmatpush1.bf16.msra.mxu0 %v3473_v12  ;;  %3458 = vmatpush1.bf16.msra.mxu1 %v3473_v12 }
  0x1f   :  { %1027 = vmatprep.subr.bf16.mxu0 %v3692_v1  ;;  %3449 = vmatprep.subr.bf16.mxu1 %v3692_v1 }
  0x22   :  { %1028 = vmatpush2.bf16.msra.mxu0 %v997_v15  ;;  %3459 = vmatpush2.bf16.msra.mxu1 %v997_v15 }
  0x23   :  { %1029 = vmatprep.subr.bf16.mxu0 %v3692_v1  ;;  %3450 = vmatprep.subr.bf16.mxu1 %v3692_v1 }
  0x26   :  { %1030 = vmatpush2.bf16.msra.mxu0 %v3475_v16  ;;  %3460 = vmatpush2.bf16.msra.mxu1 %v3475_v16 }
  0x29   :  { %1032 = vmatmul.mubr.bf16.vlgmr.msra.gmra.mxu0 %v3476_v17  ;;  %1288 = vmatmul.mubr.bf16.vlgmr.msra.gmra.mxu1 %v3479_v18 }
  0x2a   :  { %2737 = vmatprep.mubr.msk.bf16.mxu0 %vm799_vm0, %v3482_v19  ;;  %2769 = vmatprep.mubr.msk.bf16.mxu1 %vm799_vm0, %v3484_v20 }
  0x31   :  { %1040 = vmatmul.mubr.bf16.gmra.mxu0 %v3486_v21  ;;  %1296 = vmatmul.mubr.bf16.gmra.mxu1 %v3487_v22 }
  0x32   :  { %2738 = vmatprep.mubr.msk.bf16.mxu0 %vm799_vm0, %v3488_v23  ;;  %2770 = vmatprep.mubr.msk.bf16.mxu1 %vm799_vm0, %v3490_v24 }
  0x39   :  { %1048 = vmatmul.mubr.bf16.gmra.mxu0 %v3492_v25  ;;  %1304 = vmatmul.mubr.bf16.gmra.mxu1 %v3493_v26 }
  0x3a   :  { %2739 = vmatprep.mubr.msk.bf16.mxu0 %vm799_vm0, %v3494_v27  ;;  %2771 = vmatprep.mubr.msk.bf16.mxu1 %vm799_vm0, %v3496_v28 }
  0x41   :  { %1056 = vmatmul.mubr.bf16.gmra.mxu0 %v3498_v29  ;;  %1312 = vmatmul.mubr.bf16.gmra.mxu1 %v3499_v30 }
  0x42   :  { %2740 = vmatprep.mubr.msk.bf16.mxu0 %vm799_vm0, %v3500_v31  ;;  %2772 = vmatprep.mubr.msk.bf16.mxu1 %vm799_vm0, %v3502_v32 }
  0x49   :  { %1064 = vmatmul.mubr.bf16.gmra.mxu0 %v3504_v33  ;;  %1320 = vmatmul.mubr.bf16.gmra.mxu1 %v3505_v34 }
  0x4a   :  { %2741 = vmatprep.mubr.msk.bf16.mxu0 %vm799_vm0, %v3506_v35  ;;  %2773 = vmatprep.mubr.msk.bf16.mxu1 %vm799_vm0, %v3508_v36 }
  0x51   :  { %1072 = vmatmul.mubr.bf16.gmra.mxu0 %v3510_v37  ;;  %1328 = vmatmul.mubr.bf16.gmra.mxu1 %v3511_v38 }
  0x52   :  { %2742 = vmatprep.mubr.msk.bf16.mxu0 %vm799_vm0, %v3512_v39  ;;  %2774 = vmatprep.mubr.msk.bf16.mxu1 %vm799_vm0, %v3514_v40 }
  0x53   :  { %9 = vsyncpa [#allocation3], 0  ;;  %v3516_v41 = vld [vmem:[%s4479_s0 + $0x60] ss:$8 sps:$4 sm:$0xff]   ;;  %v3518_v43 = vld [vmem:[%s4479_s0 + $0x74] ss:$8 sps:$4 sm:$0xff]  }
  0x54   :  { %v3517_v42 = vld [vmem:[%s4479_s0 + $0x260] ss:$8 sps:$4 sm:$0xff]   ;;  %v3520_v44 = vld [vmem:[%s4479_s0 + $0x274] ss:$8 sps:$4 sm:$0xff]   ;;  %v3522_v45 = vld [vmem:[%s4479_s0 + $0x70] ss:$8 sps:$4 sm:$0xff]  }
  0x55   :  { %v3523_v46 = vld [vmem:[%s4479_s0 + $0x270] ss:$8 sps:$4 sm:$0xff]   ;;  %v3524_v47 = vld [vmem:[%s4479_s0 + $0x84] ss:$8 sps:$4 sm:$0xff]   ;;  %v3528_v49 = vld [vmem:[%s4479_s0 + $0x80] ss:$8 sps:$4 sm:$0xff]  }
  0x56   :  { %v3526_v48 = vld [vmem:[%s4479_s0 + $0x284] ss:$8 sps:$4 sm:$0xff]   ;;  %v3529_v50 = vld [vmem:[%s4479_s0 + $0x280] ss:$8 sps:$4 sm:$0xff]   ;;  %v3530_v51 = vld [vmem:[%s4479_s0 + $0x94] ss:$8 sps:$4 sm:$0xff]  }
  0x57   :  { %v3532_v52 = vld [vmem:[%s4479_s0 + $0x294] ss:$8 sps:$4 sm:$0xff]   ;;  %v3534_v53 = vld [vmem:[%s4479_s0 + $0x90] ss:$8 sps:$4 sm:$0xff]   ;;  %v3536_v55 = vld [vmem:[%s4479_s0 + $0xa4] ss:$8 sps:$4 sm:$0xff]  }
  0x58   :  { %v3535_v54 = vld [vmem:[%s4479_s0 + $0x290] ss:$8 sps:$4 sm:$0xff]   ;;  %v3538_v56 = vld [vmem:[%s4479_s0 + $0x2a4] ss:$8 sps:$4 sm:$0xff]   ;;  %v3540_v57 = vld [vmem:[%s4479_s0 + $0xa0] ss:$8 sps:$4 sm:$0xff]  }
  0x59   :  { %1080 = vmatmul.mubr.bf16.gmra.mxu0 %v3516_v41  ;;  %1336 = vmatmul.mubr.bf16.gmra.mxu1 %v3517_v42  ;;  %v3541_v58 = vld [vmem:[%s4479_s0 + $0x2a0] ss:$8 sps:$4 sm:$0xff]   ;;  %v3542_v59 = vld [vmem:[%s4479_s0 + $0xb4] ss:$8 sps:$4 sm:$0xff]   ;;  %v3546_v61 = vld [vmem:[%s4479_s0 + $0xb0] ss:$8 sps:$4 sm:$0xff]  }
  0x5a   :  { %2743 = vmatprep.mubr.msk.bf16.mxu0 %vm799_vm0, %v3518_v43  ;;  %2775 = vmatprep.mubr.msk.bf16.mxu1 %vm799_vm0, %v3520_v44  ;;  %v3544_v60 = vld [vmem:[%s4479_s0 + $0x2b4] ss:$8 sps:$4 sm:$0xff]   ;;  %v3547_v62 = vld [vmem:[%s4479_s0 + $0x2b0] ss:$8 sps:$4 sm:$0xff]   ;;  %v3548_v63 = vld [vmem:[%s4479_s0 + $0xc4] ss:$8 sps:$4 sm:$0xff]  }
  0x5b   :  { %v3550_v0 = vld [vmem:[%s4479_s0 + $0x2c4] ss:$8 sps:$4 sm:$0xff]   ;;  %v3552_v1 = vld [vmem:[%s4479_s0 + $0xc0] ss:$8 sps:$4 sm:$0xff]   ;;  %v3554_v3 = vld [vmem:[%s4479_s0 + $0xd4] ss:$8 sps:$4 sm:$0xff]  }
  0x5c   :  { %v3553_v2 = vld [vmem:[%s4479_s0 + $0x2c0] ss:$8 sps:$4 sm:$0xff]   ;;  %v3556_v4 = vld [vmem:[%s4479_s0 + $0x2d4] ss:$8 sps:$4 sm:$0xff]   ;;  %v3558_v5 = vld [vmem:[%s4479_s0 + $0xd0] ss:$8 sps:$4 sm:$0xff]  }
  0x5d   :  { %v3559_v6 = vld [vmem:[%s4479_s0 + $0x2d0] ss:$8 sps:$4 sm:$0xff]   ;;  %v3560_v7 = vld [vmem:[%s4479_s0 + $0xe4] ss:$8 sps:$4 sm:$0xff]   ;;  %v3564_v9 = vld [vmem:[%s4479_s0 + $0xe0] ss:$8 sps:$4 sm:$0xff]  }
  0x5e   :  { %v3562_v8 = vld [vmem:[%s4479_s0 + $0x2e4] ss:$8 sps:$4 sm:$0xff]   ;;  %v3565_v10 = vld [vmem:[%s4479_s0 + $0x2e0] ss:$8 sps:$4 sm:$0xff]   ;;  %v3566_v11 = vld [vmem:[%s4479_s0 + $0xf4] ss:$8 sps:$4 sm:$0xff]  }
  0x5f   :  { %v3568_v12 = vld [vmem:[%s4479_s0 + $0x2f4] ss:$8 sps:$4 sm:$0xff]   ;;  %v3570_v13 = vld [vmem:[%s4479_s0 + $0xf0] ss:$8 sps:$4 sm:$0xff]   ;;  %v3572_v15 = vld [vmem:[%s4479_s0 + $0x104] ss:$8 sps:$4 sm:$0xff]  }
  0x60   :  { %v3571_v14 = vld [vmem:[%s4479_s0 + $0x2f0] ss:$8 sps:$4 sm:$0xff]   ;;  %v3574_v16 = vld [vmem:[%s4479_s0 + $0x304] ss:$8 sps:$4 sm:$0xff]   ;;  %v3576_v17 = vld [vmem:[%s4479_s0 + $0x100] ss:$8 sps:$4 sm:$0xff]  }
  0x61   :  { %1088 = vmatmul.mubr.bf16.gmra.mxu0 %v3522_v45  ;;  %1344 = vmatmul.mubr.bf16.gmra.mxu1 %v3523_v46  ;;  %v3577_v18 = vld [vmem:[%s4479_s0 + $0x300] ss:$8 sps:$4 sm:$0xff]   ;;  %v3578_v19 = vld [vmem:[%s4479_s0 + $0x114] ss:$8 sps:$4 sm:$0xff]   ;;  %v3582_v21 = vld [vmem:[%s4479_s0 + $0x110] ss:$8 sps:$4 sm:$0xff]  }
  0x62   :  { %2744 = vmatprep.mubr.msk.bf16.mxu0 %vm799_vm0, %v3524_v47  ;;  %2776 = vmatprep.mubr.msk.bf16.mxu1 %vm799_vm0, %v3526_v48  ;;  %v3580_v20 = vld [vmem:[%s4479_s0 + $0x314] ss:$8 sps:$4 sm:$0xff]   ;;  %v3583_v22 = vld [vmem:[%s4479_s0 + $0x310] ss:$8 sps:$4 sm:$0xff]   ;;  %v3584_v23 = vld [vmem:[%s4479_s0 + $0x124] ss:$8 sps:$4 sm:$0xff]  }
  0x63   :  { %v3586_v24 = vld [vmem:[%s4479_s0 + $0x324] ss:$8 sps:$4 sm:$0xff]   ;;  %v3588_v25 = vld [vmem:[%s4479_s0 + $0x120] ss:$8 sps:$4 sm:$0xff]   ;;  %v3590_v27 = vld [vmem:[%s4479_s0 + $0x134] ss:$8 sps:$4 sm:$0xff]  }
  0x64   :  { %v3589_v26 = vld [vmem:[%s4479_s0 + $0x320] ss:$8 sps:$4 sm:$0xff]   ;;  %v3592_v28 = vld [vmem:[%s4479_s0 + $0x334] ss:$8 sps:$4 sm:$0xff]   ;;  %v3594_v29 = vld [vmem:[%s4479_s0 + $0x130] ss:$8 sps:$4 sm:$0xff]  }
  0x65   :  { %v3595_v30 = vld [vmem:[%s4479_s0 + $0x330] ss:$8 sps:$4 sm:$0xff]   ;;  %v3596_v31 = vld [vmem:[%s4479_s0 + $0x144] ss:$8 sps:$4 sm:$0xff]   ;;  %v3600_v33 = vld [vmem:[%s4479_s0 + $0x140] ss:$8 sps:$4 sm:$0xff]  }
  0x66   :  { %v3598_v32 = vld [vmem:[%s4479_s0 + $0x344] ss:$8 sps:$4 sm:$0xff]   ;;  %v3601_v34 = vld [vmem:[%s4479_s0 + $0x340] ss:$8 sps:$4 sm:$0xff]   ;;  %v3602_v35 = vld [vmem:[%s4479_s0 + $0x154] ss:$8 sps:$4 sm:$0xff]  }
  0x67   :  { %v3604_v36 = vld [vmem:[%s4479_s0 + $0x354] ss:$8 sps:$4 sm:$0xff]   ;;  %v3606_v37 = vld [vmem:[%s4479_s0 + $0x150] ss:$8 sps:$4 sm:$0xff]   ;;  %v3608_v39 = vld [vmem:[%s4479_s0 + $0x164] ss:$8 sps:$4 sm:$0xff]  }
  0x68   :  { %v3607_v38 = vld [vmem:[%s4479_s0 + $0x350] ss:$8 sps:$4 sm:$0xff]   ;;  %v3610_v40 = vld [vmem:[%s4479_s0 + $0x364] ss:$8 sps:$4 sm:$0xff]   ;;  %v3612_v41 = vld [vmem:[%s4479_s0 + $0x160] ss:$8 sps:$4 sm:$0xff]  }
  0x69   :  { %1096 = vmatmul.mubr.bf16.gmra.mxu0 %v3528_v49  ;;  %1352 = vmatmul.mubr.bf16.gmra.mxu1 %v3529_v50  ;;  %v3613_v42 = vld [vmem:[%s4479_s0 + $0x360] ss:$8 sps:$4 sm:$0xff]   ;;  %v3614_v43 = vld [vmem:[%s4479_s0 + $0x174] ss:$8 sps:$4 sm:$0xff]   ;;  %v3618_v45 = vld [vmem:[%s4479_s0 + $0x170] ss:$8 sps:$4 sm:$0xff]  }
  0x6a   :  { %2745 = vmatprep.mubr.msk.bf16.mxu0 %vm799_vm0, %v3530_v51  ;;  %2777 = vmatprep.mubr.msk.bf16.mxu1 %vm799_vm0, %v3532_v52  ;;  %v3616_v44 = vld [vmem:[%s4479_s0 + $0x374] ss:$8 sps:$4 sm:$0xff]   ;;  %v3619_v46 = vld [vmem:[%s4479_s0 + $0x370] ss:$8 sps:$4 sm:$0xff]   ;;  %v3620_v47 = vld [vmem:[%s4479_s0 + $0x184] ss:$8 sps:$4 sm:$0xff]  }
  0x6b   :  { %v3622_v48 = vld [vmem:[%s4479_s0 + $0x384] ss:$8 sps:$4 sm:$0xff]   ;;  %v3624_v49 = vld [vmem:[%s4479_s0 + $0x180] ss:$8 sps:$4 sm:$0xff]   ;;  %v3626_v51 = vld [vmem:[%s4479_s0 + $0x194] ss:$8 sps:$4 sm:$0xff]  }
  0x6c   :  { %v3625_v50 = vld [vmem:[%s4479_s0 + $0x380] ss:$8 sps:$4 sm:$0xff]   ;;  %v3628_v52 = vld [vmem:[%s4479_s0 + $0x394] ss:$8 sps:$4 sm:$0xff]  }
  0x71   :  { %1104 = vmatmul.mubr.bf16.gmra.mxu0 %v3534_v53  ;;  %1360 = vmatmul.mubr.bf16.gmra.mxu1 %v3535_v54  ;;  %v4111_v53 = vld [vmem:[%s4481_s2] ss:$0 sm:$0xff] }
  0x72   :  { %2746 = vmatprep.mubr.msk.bf16.mxu0 %vm799_vm0, %v3536_v55  ;;  %2778 = vmatprep.mubr.msk.bf16.mxu1 %vm799_vm0, %v3538_v56 }
  0x79   :  { %1112 = vmatmul.mubr.bf16.gmra.mxu0 %v3540_v57  ;;  %1368 = vmatmul.mubr.bf16.gmra.mxu1 %v3541_v58  ;;  %v4117_v57 = vld [vmem:[%s4482_s3] ss:$0 sm:$0xff] }
  0x7a   :  { %2747 = vmatprep.mubr.msk.bf16.mxu0 %vm799_vm0, %v3542_v59  ;;  %2779 = vmatprep.mubr.msk.bf16.mxu1 %vm799_vm0, %v3544_v60 }
  0x81   :  { %1120 = vmatmul.mubr.bf16.gmra.mxu0 %v3546_v61  ;;  %1376 = vmatmul.mubr.bf16.gmra.mxu1 %v3547_v62 }
  0x82   :  { %2748 = vmatprep.mubr.msk.bf16.mxu0 %vm799_vm0, %v3548_v63  ;;  %2780 = vmatprep.mubr.msk.bf16.mxu1 %vm799_vm0, %v3550_v0 }
  0x89   :  { %1128 = vmatmul.mubr.bf16.gmra.mxu0 %v3552_v1  ;;  %1384 = vmatmul.mubr.bf16.gmra.mxu1 %v3553_v2  ;;  %v3630_v1 = vld [vmem:[%s4479_s0 + $0x190] ss:$8 sps:$4 sm:$0xff]  }
  0x8a   :  { %2749 = vmatprep.mubr.msk.bf16.mxu0 %vm799_vm0, %v3554_v3  ;;  %2781 = vmatprep.mubr.msk.bf16.mxu1 %vm799_vm0, %v3556_v4  ;;  %v3631_v2 = vld [vmem:[%s4479_s0 + $0x390] ss:$8 sps:$4 sm:$0xff]  }
  0x91   :  { %1136 = vmatmul.mubr.bf16.gmra.mxu0 %v3558_v5  ;;  %1392 = vmatmul.mubr.bf16.gmra.mxu1 %v3559_v6  ;;  %v3632_v5 = vld [vmem:[%s4479_s0 + $0x1a4] ss:$8 sps:$4 sm:$0xff]  }
  0x92   :  { %2750 = vmatprep.mubr.msk.bf16.mxu0 %vm799_vm0, %v3560_v7  ;;  %2782 = vmatprep.mubr.msk.bf16.mxu1 %vm799_vm0, %v3562_v8  ;;  %v3634_v6 = vld [vmem:[%s4479_s0 + $0x3a4] ss:$8 sps:$4 sm:$0xff]  }
  0x99   :  { %1144 = vmatmul.mubr.bf16.gmra.mxu0 %v3564_v9  ;;  %1400 = vmatmul.mubr.bf16.gmra.mxu1 %v3565_v10 }
  0x9a   :  { %2751 = vmatprep.mubr.msk.bf16.mxu0 %vm799_vm0, %v3566_v11  ;;  %2783 = vmatprep.mubr.msk.bf16.mxu1 %vm799_vm0, %v3568_v12 }
  0xa1   :  { %1152 = vmatmul.mubr.bf16.gmra.mxu0 %v3570_v13  ;;  %1408 = vmatmul.mubr.bf16.gmra.mxu1 %v3571_v14 }
  0xa2   :  { %2752 = vmatprep.mubr.msk.bf16.mxu0 %vm799_vm0, %v3572_v15  ;;  %2784 = vmatprep.mubr.msk.bf16.mxu1 %vm799_vm0, %v3574_v16 }
  0xa9   :  { %1160 = vmatmul.mubr.bf16.gmra.mxu0 %v3576_v17  ;;  %1416 = vmatmul.mubr.bf16.gmra.mxu1 %v3577_v18 }
  0xaa   :  { %2753 = vmatprep.mubr.msk.bf16.mxu0 %vm799_vm0, %v3578_v19  ;;  %2785 = vmatprep.mubr.msk.bf16.mxu1 %vm799_vm0, %v3580_v20 }
  0xb1   :  { %1168 = vmatmul.mubr.bf16.gmra.mxu0 %v3582_v21  ;;  %1424 = vmatmul.mubr.bf16.gmra.mxu1 %v3583_v22 }
  0xb2   :  { %2754 = vmatprep.mubr.msk.bf16.mxu0 %vm799_vm0, %v3584_v23  ;;  %2786 = vmatprep.mubr.msk.bf16.mxu1 %vm799_vm0, %v3586_v24 }
  0xb9   :  { %1176 = vmatmul.mubr.bf16.gmra.mxu0 %v3588_v25  ;;  %1432 = vmatmul.mubr.bf16.gmra.mxu1 %v3589_v26 }
  0xba   :  { %2755 = vmatprep.mubr.msk.bf16.mxu0 %vm799_vm0, %v3590_v27  ;;  %2787 = vmatprep.mubr.msk.bf16.mxu1 %vm799_vm0, %v3592_v28  ;;  %v3636_v27 = vld [vmem:[%s4479_s0 + $0x1a0] ss:$8 sps:$4 sm:$0xff]  }
  0xbb   :  { %v3637_v28 = vld [vmem:[%s4479_s0 + $0x3a0] ss:$8 sps:$4 sm:$0xff]  }
  0xc1   :  { %1184 = vmatmul.mubr.bf16.gmra.mxu0 %v3594_v29  ;;  %1440 = vmatmul.mubr.bf16.gmra.mxu1 %v3595_v30 }
  0xc2   :  { %2756 = vmatprep.mubr.msk.bf16.mxu0 %vm799_vm0, %v3596_v31  ;;  %2788 = vmatprep.mubr.msk.bf16.mxu1 %vm799_vm0, %v3598_v32  ;;  %v3638_v31 = vld [vmem:[%s4479_s0 + $0x1b4] ss:$8 sps:$4 sm:$0xff]  }
  0xc3   :  { %v3640_v32 = vld [vmem:[%s4479_s0 + $0x3b4] ss:$8 sps:$4 sm:$0xff]  }
  0xc9   :  { %1192 = vmatmul.mubr.bf16.gmra.mxu0 %v3600_v33  ;;  %1448 = vmatmul.mubr.bf16.gmra.mxu1 %v3601_v34 }
  0xca   :  { %2757 = vmatprep.mubr.msk.bf16.mxu0 %vm799_vm0, %v3602_v35  ;;  %2789 = vmatprep.mubr.msk.bf16.mxu1 %vm799_vm0, %v3604_v36 }
  0xd1   :  { %1200 = vmatmul.mubr.bf16.gmra.mxu0 %v3606_v37  ;;  %1456 = vmatmul.mubr.bf16.gmra.mxu1 %v3607_v38 }
  0xd2   :  { %2758 = vmatprep.mubr.msk.bf16.mxu0 %vm799_vm0, %v3608_v39  ;;  %2790 = vmatprep.mubr.msk.bf16.mxu1 %vm799_vm0, %v3610_v40 }
  0xd9   :  { %1208 = vmatmul.mubr.bf16.gmra.mxu0 %v3612_v41  ;;  %1464 = vmatmul.mubr.bf16.gmra.mxu1 %v3613_v42 }
  0xda   :  { %2759 = vmatprep.mubr.msk.bf16.mxu0 %vm799_vm0, %v3614_v43  ;;  %2791 = vmatprep.mubr.msk.bf16.mxu1 %vm799_vm0, %v3616_v44 }
  0xe1   :  { %1216 = vmatmul.mubr.bf16.gmra.mxu0 %v3618_v45  ;;  %1472 = vmatmul.mubr.bf16.gmra.mxu1 %v3619_v46 }
  0xe2   :  { %2760 = vmatprep.mubr.msk.bf16.mxu0 %vm799_vm0, %v3620_v47  ;;  %2792 = vmatprep.mubr.msk.bf16.mxu1 %vm799_vm0, %v3622_v48 }
  0xe9   :  { %v1033_v54 = vpop.f32.mrf.mxu0  ;;  %1224 = vmatmul.mubr.bf16.gmra.mxu0 %v3624_v49  ;;  %v1289_v55 = vpop.f32.mrf.mxu1  ;;  %1480 = vmatmul.mubr.bf16.gmra.mxu1 %v3625_v50 }
  0xea   :  { %v1551_v56 = vmul.f32 %v4111_v53, %v1033_v54  ;;  %v1615_v58 = vmul.f32 %v4111_v53, %v1289_v55  ;;  %2761 = vmatprep.mubr.msk.bf16.mxu0 %vm799_vm0, %v3626_v51  ;;  %2793 = vmatprep.mubr.msk.bf16.mxu1 %vm799_vm0, %v3628_v52  ;;  %v3642_v54 = vld [vmem:[%s4479_s0 + $0x1b0] ss:$8 sps:$4 sm:$0xff]  }
  0xeb   :  { %v1035_v59 = vpop.f32.mrf.mxu0  ;;  %v1291_v60 = vpop.f32.mrf.mxu1  ;;  %v3643_v55 = vld [vmem:[%s4479_s0 + $0x3b0] ss:$8 sps:$4 sm:$0xff]  }
  0xec   :  { %v1686_v61 = vadd.f32 %v4117_v57, %v1551_v56  ;;  %v1750_v62 = vadd.f32 %v4117_v57, %v1615_v58  ;;  %v3644_v59 = vld [vmem:[%s4479_s0 + $0x1c4] ss:$8 sps:$4 sm:$0xff]  }
  0xed   :  { %v1036_v63 = vpop.f32.mrf.mxu0  ;;  %v1292_v0 = vpop.f32.mrf.mxu1  ;;  %v3646_v60 = vld [vmem:[%s4479_s0 + $0x3c4] ss:$8 sps:$4 sm:$0xff]  }
  0xee   :  { %v1552_v3 = vmul.f32 %v4111_v53, %v1036_v63  ;;  %v1616_v4 = vmul.f32 %v4111_v53, %v1292_v0  ;;  %v1814_v11 = vmax.f32 %v1686_v61, 0.0  ;;  %v1878_v12 = vmax.f32 %v1750_v62, 0.0 }
  0xef   :  { %v1038_v7 = vpop.f32.mrf.mxu0  ;;  %v1294_v8 = vpop.f32.mrf.mxu1 }
  0xf0   :  { %v1687_v9 = vadd.f32 %v4117_v57, %v1552_v3  ;;  %v1751_v10 = vadd.f32 %v4117_v57, %v1616_v4 }
  0xf1   :  { %v1041_v13 = vpop.f32.mrf.mxu0  ;;  %1232 = vmatmul.mubr.bf16.gmra.mxu0 %v3630_v1  ;;  %v1297_v14 = vpop.f32.mrf.mxu1  ;;  %1488 = vmatmul.mubr.bf16.gmra.mxu1 %v3631_v2 }
  0xf2   :  { %v1815_v15 = vmax.f32 %v1687_v9, 0.0  ;;  %v1879_v16 = vmax.f32 %v1751_v10, 0.0  ;;  %v1553_v17 = vmul.f32 %v4111_v53, %v1041_v13  ;;  %v1617_v18 = vmul.f32 %v4111_v53, %v1297_v14  ;;  %2762 = vmatprep.mubr.msk.bf16.mxu0 %vm799_vm0, %v3632_v5  ;;  %2794 = vmatprep.mubr.msk.bf16.mxu1 %vm799_vm0, %v3634_v6 }
  0xf3   :  { %v1043_v19 = vpop.f32.mrf.mxu0  ;;  %v1299_v20 = vpop.f32.mrf.mxu1 }
  0xf4   :  { %v3061_v21 = vpack.c.bf16 %v1815_v15, %v1814_v11  ;;  %v3221_v22 = vpack.c.bf16 %v1879_v16, %v1878_v12  ;;  %v1688_v23 = vadd.f32 %v4117_v57, %v1553_v17  ;;  %v1752_v24 = vadd.f32 %v4117_v57, %v1617_v18  ;;  %v3648_v17 = vld [vmem:[%s4479_s0 + $0x1c0] ss:$8 sps:$4 sm:$0xff]  }
  0xf5   :  { %v1044_v25 = vpop.f32.mrf.mxu0  ;;  %v1300_v26 = vpop.f32.mrf.mxu1  ;;  %v3649_v18 = vld [vmem:[%s4479_s0 + $0x3c0] ss:$8 sps:$4 sm:$0xff]  }
  0xf6   :  { %3062 = vst [vmem:[#allocation2] sm:$0xff] %v3061_v21   ;;  %3409 = vst [vmem:[#allocation2 + $0x100] sm:$0xff] %v3221_v22   ;;  %v1554_v29 = vmul.f32 %v4111_v53, %v1044_v25  ;;  %v1618_v30 = vmul.f32 %v4111_v53, %v1300_v26  ;;  %v1816_v37 = vmax.f32 %v1688_v23, 0.0  ;;  %v1880_v38 = vmax.f32 %v1752_v24, 0.0  ;;  %v3650_v21 = vld [vmem:[%s4479_s0 + $0x1d4] ss:$8 sps:$4 sm:$0xff]  }
  0xf7   :  { %v1046_v33 = vpop.f32.mrf.mxu0  ;;  %v1302_v34 = vpop.f32.mrf.mxu1  ;;  %v3652_v22 = vld [vmem:[%s4479_s0 + $0x3d4] ss:$8 sps:$4 sm:$0xff]  }
  0xf8   :  { %v1689_v35 = vadd.f32 %v4117_v57, %v1554_v29  ;;  %v1753_v36 = vadd.f32 %v4117_v57, %v1618_v30 }
  0xf9   :  { %v1049_v39 = vpop.f32.mrf.mxu0  ;;  %1240 = vmatmul.mubr.bf16.gmra.mxu0 %v3636_v27  ;;  %v1305_v40 = vpop.f32.mrf.mxu1  ;;  %1496 = vmatmul.mubr.bf16.gmra.mxu1 %v3637_v28 }
  0xfa   :  { %v1817_v41 = vmax.f32 %v1689_v35, 0.0  ;;  %v1881_v42 = vmax.f32 %v1753_v36, 0.0  ;;  %v1555_v43 = vmul.f32 %v4111_v53, %v1049_v39  ;;  %v1619_v44 = vmul.f32 %v4111_v53, %v1305_v40  ;;  %2763 = vmatprep.mubr.msk.bf16.mxu0 %vm799_vm0, %v3638_v31  ;;  %2795 = vmatprep.mubr.msk.bf16.mxu1 %vm799_vm0, %v3640_v32 }
  0xfb   :  { %v1051_v45 = vpop.f32.mrf.mxu0  ;;  %v1307_v46 = vpop.f32.mrf.mxu1 }
  0xfc   :  { %v3066_v47 = vpack.c.bf16 %v1817_v41, %v1816_v37  ;;  %v3226_v48 = vpack.c.bf16 %v1881_v42, %v1880_v38  ;;  %v1690_v49 = vadd.f32 %v4117_v57, %v1555_v43  ;;  %v1754_v50 = vadd.f32 %v4117_v57, %v1619_v44  ;;  %v3654_v43 = vld [vmem:[%s4479_s0 + $0x1d0] ss:$8 sps:$4 sm:$0xff]  }
  0xfd   :  { %v1052_v51 = vpop.f32.mrf.mxu0  ;;  %v1308_v52 = vpop.f32.mrf.mxu1  ;;  %v3655_v44 = vld [vmem:[%s4479_s0 + $0x3d0] ss:$8 sps:$4 sm:$0xff]  }
  0xfe   :  { %3378 = vst [vmem:[#allocation2 + $0x8] sm:$0xff] %v3066_v47   ;;  %3410 = vst [vmem:[#allocation2 + $0x108] sm:$0xff] %v3226_v48   ;;  %v1556_v56 = vmul.f32 %v4111_v53, %v1052_v51  ;;  %v1620_v58 = vmul.f32 %v4111_v53, %v1308_v52  ;;  %v1818_v1 = vmax.f32 %v1690_v49, 0.0  ;;  %v1882_v2 = vmax.f32 %v1754_v50, 0.0  ;;  %v3656_v47 = vld [vmem:[%s4479_s0 + $0x1e4] ss:$8 sps:$4 sm:$0xff]  }
  0xff   :  { %v1054_v61 = vpop.f32.mrf.mxu0  ;;  %v1310_v62 = vpop.f32.mrf.mxu1  ;;  %v3658_v48 = vld [vmem:[%s4479_s0 + $0x3e4] ss:$8 sps:$4 sm:$0xff]  }
 0x100   :  { %v1691_v63 = vadd.f32 %v4117_v57, %v1556_v56  ;;  %v1755_v0 = vadd.f32 %v4117_v57, %v1620_v58 }
 0x101   :  { %v1057_v3 = vpop.f32.mrf.mxu0  ;;  %1248 = vmatmul.mubr.bf16.gmra.mxu0 %v3642_v54  ;;  %v1313_v4 = vpop.f32.mrf.mxu1  ;;  %1504 = vmatmul.mubr.bf16.gmra.mxu1 %v3643_v55 }
 0x102   :  { %v1819_v5 = vmax.f32 %v1691_v63, 0.0  ;;  %v1883_v6 = vmax.f32 %v1755_v0, 0.0  ;;  %v1557_v7 = vmul.f32 %v4111_v53, %v1057_v3  ;;  %v1621_v8 = vmul.f32 %v4111_v53, %v1313_v4  ;;  %2764 = vmatprep.mubr.msk.bf16.mxu0 %vm799_vm0, %v3644_v59  ;;  %2796 = vmatprep.mubr.msk.bf16.mxu1 %vm799_vm0, %v3646_v60 }
 0x103   :  { %v1059_v9 = vpop.f32.mrf.mxu0  ;;  %v1315_v10 = vpop.f32.mrf.mxu1 }
 0x104   :  { %v3071_v11 = vpack.c.bf16 %v1819_v5, %v1818_v1  ;;  %v3231_v12 = vpack.c.bf16 %v1883_v6, %v1882_v2  ;;  %v1692_v13 = vadd.f32 %v4117_v57, %v1557_v7  ;;  %v1756_v14 = vadd.f32 %v4117_v57, %v1621_v8  ;;  %v3660_v7 = vld [vmem:[%s4479_s0 + $0x1e0] ss:$8 sps:$4 sm:$0xff]  }
 0x105   :  { %v1060_v15 = vpop.f32.mrf.mxu0  ;;  %v1316_v16 = vpop.f32.mrf.mxu1  ;;  %v3661_v8 = vld [vmem:[%s4479_s0 + $0x3e0] ss:$8 sps:$4 sm:$0xff]  }
 0x106   :  { %3379 = vst [vmem:[#allocation2 + $0x10] sm:$0xff] %v3071_v11   ;;  %3411 = vst [vmem:[#allocation2 + $0x110] sm:$0xff] %v3231_v12   ;;  %v1558_v19 = vmul.f32 %v4111_v53, %v1060_v15  ;;  %v1622_v20 = vmul.f32 %v4111_v53, %v1316_v16  ;;  %v1820_v27 = vmax.f32 %v1692_v13, 0.0  ;;  %v1884_v28 = vmax.f32 %v1756_v14, 0.0  ;;  %v3662_v11 = vld [vmem:[%s4479_s0 + $0x1f4] ss:$8 sps:$4 sm:$0xff]  }
 0x107   :  { %v1062_v23 = vpop.f32.mrf.mxu0  ;;  %v1318_v24 = vpop.f32.mrf.mxu1  ;;  %v3664_v12 = vld [vmem:[%s4479_s0 + $0x3f4] ss:$8 sps:$4 sm:$0xff]  }
 0x108   :  { %v1693_v25 = vadd.f32 %v4117_v57, %v1558_v19  ;;  %v1757_v26 = vadd.f32 %v4117_v57, %v1622_v20 }
 0x109   :  { %v1065_v29 = vpop.f32.mrf.mxu0  ;;  %1256 = vmatmul.mubr.bf16.gmra.mxu0 %v3648_v17  ;;  %v1321_v30 = vpop.f32.mrf.mxu1  ;;  %1512 = vmatmul.mubr.bf16.gmra.mxu1 %v3649_v18 }
 0x10a   :  { %v1821_v31 = vmax.f32 %v1693_v25, 0.0  ;;  %v1885_v32 = vmax.f32 %v1757_v26, 0.0  ;;  %v1559_v33 = vmul.f32 %v4111_v53, %v1065_v29  ;;  %v1623_v34 = vmul.f32 %v4111_v53, %v1321_v30  ;;  %2765 = vmatprep.mubr.msk.bf16.mxu0 %vm799_vm0, %v3650_v21  ;;  %2797 = vmatprep.mubr.msk.bf16.mxu1 %vm799_vm0, %v3652_v22 }
 0x10b   :  { %v1067_v35 = vpop.f32.mrf.mxu0  ;;  %v1323_v36 = vpop.f32.mrf.mxu1 }
 0x10c   :  { %v3076_v37 = vpack.c.bf16 %v1821_v31, %v1820_v27  ;;  %v3236_v38 = vpack.c.bf16 %v1885_v32, %v1884_v28  ;;  %v1694_v39 = vadd.f32 %v4117_v57, %v1559_v33  ;;  %v1758_v40 = vadd.f32 %v4117_v57, %v1623_v34  ;;  %v3666_v33 = vld [vmem:[%s4479_s0 + $0x1f0] ss:$8 sps:$4 sm:$0xff]  }
 0x10d   :  { %v1068_v41 = vpop.f32.mrf.mxu0  ;;  %v1324_v42 = vpop.f32.mrf.mxu1  ;;  %v3667_v34 = vld [vmem:[%s4479_s0 + $0x3f0] ss:$8 sps:$4 sm:$0xff]  }
 0x10e   :  { %3380 = vst [vmem:[#allocation2 + $0x18] sm:$0xff] %v3076_v37   ;;  %3412 = vst [vmem:[#allocation2 + $0x118] sm:$0xff] %v3236_v38   ;;  %v1560_v45 = vmul.f32 %v4111_v53, %v1068_v41  ;;  %v1624_v46 = vmul.f32 %v4111_v53, %v1324_v42  ;;  %v1822_v54 = vmax.f32 %v1694_v39, 0.0  ;;  %v1886_v55 = vmax.f32 %v1758_v40, 0.0 }
 0x10f   :  { %v1070_v49 = vpop.f32.mrf.mxu0  ;;  %v1326_v50 = vpop.f32.mrf.mxu1 }
 0x110   :  { %v1695_v51 = vadd.f32 %v4117_v57, %v1560_v45  ;;  %v1759_v52 = vadd.f32 %v4117_v57, %v1624_v46 }
 0x111   :  { %v1073_v56 = vpop.f32.mrf.mxu0  ;;  %1264 = vmatmul.mubr.bf16.gmra.mxu0 %v3654_v43  ;;  %v1329_v58 = vpop.f32.mrf.mxu1  ;;  %1520 = vmatmul.mubr.bf16.gmra.mxu1 %v3655_v44 }
 0x112   :  { %v1823_v59 = vmax.f32 %v1695_v51, 0.0  ;;  %v1887_v60 = vmax.f32 %v1759_v52, 0.0  ;;  %v1561_v61 = vmul.f32 %v4111_v53, %v1073_v56  ;;  %v1625_v62 = vmul.f32 %v4111_v53, %v1329_v58  ;;  %2766 = vmatprep.mubr.msk.bf16.mxu0 %vm799_vm0, %v3656_v47  ;;  %2798 = vmatprep.mubr.msk.bf16.mxu1 %vm799_vm0, %v3658_v48 }
 0x113   :  { %v1075_v63 = vpop.f32.mrf.mxu0  ;;  %v1331_v0 = vpop.f32.mrf.mxu1 }
 0x114   :  { %v3081_v1 = vpack.c.bf16 %v1823_v59, %v1822_v54  ;;  %v3241_v2 = vpack.c.bf16 %v1887_v60, %v1886_v55  ;;  %v1696_v3 = vadd.f32 %v4117_v57, %v1561_v61  ;;  %v1760_v4 = vadd.f32 %v4117_v57, %v1625_v62 }
 0x115   :  { %v1076_v5 = vpop.f32.mrf.mxu0  ;;  %v1332_v6 = vpop.f32.mrf.mxu1 }
 0x116   :  { %3381 = vst [vmem:[#allocation2 + $0x20] sm:$0xff] %v3081_v1   ;;  %3413 = vst [vmem:[#allocation2 + $0x120] sm:$0xff] %v3241_v2   ;;  %v1562_v9 = vmul.f32 %v4111_v53, %v1076_v5  ;;  %v1626_v10 = vmul.f32 %v4111_v53, %v1332_v6  ;;  %v1824_v17 = vmax.f32 %v1696_v3, 0.0  ;;  %v1888_v18 = vmax.f32 %v1760_v4, 0.0 }
 0x117   :  { %v1078_v13 = vpop.f32.mrf.mxu0  ;;  %v1334_v14 = vpop.f32.mrf.mxu1 }
 0x118   :  { %v1697_v15 = vadd.f32 %v4117_v57, %v1562_v9  ;;  %v1761_v16 = vadd.f32 %v4117_v57, %v1626_v10 }
 0x119   :  { %v1081_v19 = vpop.f32.mrf.mxu0  ;;  %1272 = vmatmul.mubr.bf16.gmra.mxu0 %v3660_v7  ;;  %v1337_v20 = vpop.f32.mrf.mxu1  ;;  %1528 = vmatmul.mubr.bf16.gmra.mxu1 %v3661_v8 }
 0x11a   :  { %v1825_v21 = vmax.f32 %v1697_v15, 0.0  ;;  %v1889_v22 = vmax.f32 %v1761_v16, 0.0  ;;  %v1563_v23 = vmul.f32 %v4111_v53, %v1081_v19  ;;  %v1627_v24 = vmul.f32 %v4111_v53, %v1337_v20  ;;  %2767 = vmatprep.mubr.msk.bf16.mxu0 %vm799_vm0, %v3662_v11  ;;  %2799 = vmatprep.mubr.msk.bf16.mxu1 %vm799_vm0, %v3664_v12 }
 0x11b   :  { %v1083_v25 = vpop.f32.mrf.mxu0  ;;  %v1339_v26 = vpop.f32.mrf.mxu1 }
 0x11c   :  { %v3086_v27 = vpack.c.bf16 %v1825_v21, %v1824_v17  ;;  %v3246_v28 = vpack.c.bf16 %v1889_v22, %v1888_v18  ;;  %v1698_v29 = vadd.f32 %v4117_v57, %v1563_v23  ;;  %v1762_v30 = vadd.f32 %v4117_v57, %v1627_v24 }
 0x11d   :  { %v1084_v31 = vpop.f32.mrf.mxu0  ;;  %v1340_v32 = vpop.f32.mrf.mxu1 }
 0x11e   :  { %3382 = vst [vmem:[#allocation2 + $0x28] sm:$0xff] %v3086_v27   ;;  %3414 = vst [vmem:[#allocation2 + $0x128] sm:$0xff] %v3246_v28   ;;  %v1564_v35 = vmul.f32 %v4111_v53, %v1084_v31  ;;  %v1628_v36 = vmul.f32 %v4111_v53, %v1340_v32  ;;  %v1826_v41 = vmax.f32 %v1698_v29, 0.0  ;;  %v1890_v42 = vmax.f32 %v1762_v30, 0.0 }
 0x11f   :  { %v1086_v37 = vpop.f32.mrf.mxu0  ;;  %v1342_v38 = vpop.f32.mrf.mxu1 }
 0x120   :  { %v1699_v39 = vadd.f32 %v4117_v57, %v1564_v35  ;;  %v1763_v40 = vadd.f32 %v4117_v57, %v1628_v36 }
 0x121   :  { %v1089_v43 = vpop.f32.mrf.mxu0  ;;  %1280 = vmatmul.mubr.bf16.gmra.mxu0 %v3666_v33  ;;  %v1345_v44 = vpop.f32.mrf.mxu1  ;;  %1536 = vmatmul.mubr.bf16.gmra.mxu1 %v3667_v34 }
 0x122   :  { %v1827_v45 = vmax.f32 %v1699_v39, 0.0  ;;  %v1891_v46 = vmax.f32 %v1763_v40, 0.0  ;;  %v1565_v47 = vmul.f32 %v4111_v53, %v1089_v43  ;;  %v1629_v48 = vmul.f32 %v4111_v53, %v1345_v44 }
 0x123   :  { %v1091_v49 = vpop.f32.mrf.mxu0  ;;  %v1347_v50 = vpop.f32.mrf.mxu1 }
 0x124   :  { %v3091_v51 = vpack.c.bf16 %v1827_v45, %v1826_v41  ;;  %v3251_v52 = vpack.c.bf16 %v1891_v46, %v1890_v42  ;;  %v1700_v54 = vadd.f32 %v4117_v57, %v1565_v47  ;;  %v1764_v55 = vadd.f32 %v4117_v57, %v1629_v48 }
 0x125   :  { %v1092_v56 = vpop.f32.mrf.mxu0  ;;  %v1348_v58 = vpop.f32.mrf.mxu1 }
 0x126   :  { %3383 = vst [vmem:[#allocation2 + $0x30] sm:$0xff] %v3091_v51   ;;  %3415 = vst [vmem:[#allocation2 + $0x130] sm:$0xff] %v3251_v52   ;;  %v1566_v59 = vmul.f32 %v4111_v53, %v1092_v56  ;;  %v1630_v60 = vmul.f32 %v4111_v53, %v1348_v58  ;;  %v1828_v1 = vmax.f32 %v1700_v54, 0.0  ;;  %v1892_v2 = vmax.f32 %v1764_v55, 0.0 }
 0x127   :  { %v1094_v61 = vpop.f32.mrf.mxu0  ;;  %v1350_v62 = vpop.f32.mrf.mxu1 }
 0x128   :  { %v1701_v63 = vadd.f32 %v4117_v57, %v1566_v59  ;;  %v1765_v0 = vadd.f32 %v4117_v57, %v1630_v60 }
 0x129   :  { %v1097_v3 = vpop.f32.mrf.mxu0  ;;  %v1353_v4 = vpop.f32.mrf.mxu1 }
 0x12a   :  { %v1829_v5 = vmax.f32 %v1701_v63, 0.0  ;;  %v1893_v6 = vmax.f32 %v1765_v0, 0.0  ;;  %v1567_v7 = vmul.f32 %v4111_v53, %v1097_v3  ;;  %v1631_v8 = vmul.f32 %v4111_v53, %v1353_v4 }
 0x12b   :  { %v1099_v9 = vpop.f32.mrf.mxu0  ;;  %v1355_v10 = vpop.f32.mrf.mxu1 }
 0x12c   :  { %v3096_v11 = vpack.c.bf16 %v1829_v5, %v1828_v1  ;;  %v3256_v12 = vpack.c.bf16 %v1893_v6, %v1892_v2  ;;  %v1702_v13 = vadd.f32 %v4117_v57, %v1567_v7  ;;  %v1766_v14 = vadd.f32 %v4117_v57, %v1631_v8 }
 0x12d   :  { %v1100_v15 = vpop.f32.mrf.mxu0  ;;  %v1356_v16 = vpop.f32.mrf.mxu1 }
 0x12e   :  { %3384 = vst [vmem:[#allocation2 + $0x38] sm:$0xff] %v3096_v11   ;;  %3416 = vst [vmem:[#allocation2 + $0x138] sm:$0xff] %v3256_v12   ;;  %v1568_v17 = vmul.f32 %v4111_v53, %v1100_v15  ;;  %v1632_v18 = vmul.f32 %v4111_v53, %v1356_v16  ;;  %v1830_v23 = vmax.f32 %v1702_v13, 0.0  ;;  %v1894_v24 = vmax.f32 %v1766_v14, 0.0 }
 0x12f   :  { %v1102_v19 = vpop.f32.mrf.mxu0  ;;  %v1358_v20 = vpop.f32.mrf.mxu1 }
 0x130   :  { %v1703_v21 = vadd.f32 %v4117_v57, %v1568_v17  ;;  %v1767_v22 = vadd.f32 %v4117_v57, %v1632_v18 }
 0x131   :  { %v1105_v25 = vpop.f32.mrf.mxu0  ;;  %v1361_v26 = vpop.f32.mrf.mxu1 }
 0x132   :  { %v1831_v27 = vmax.f32 %v1703_v21, 0.0  ;;  %v1895_v28 = vmax.f32 %v1767_v22, 0.0  ;;  %v1569_v29 = vmul.f32 %v4111_v53, %v1105_v25  ;;  %v1633_v30 = vmul.f32 %v4111_v53, %v1361_v26 }
 0x133   :  { %v1107_v31 = vpop.f32.mrf.mxu0  ;;  %v1363_v32 = vpop.f32.mrf.mxu1 }
 0x134   :  { %v3101_v33 = vpack.c.bf16 %v1831_v27, %v1830_v23  ;;  %v3261_v34 = vpack.c.bf16 %v1895_v28, %v1894_v24  ;;  %v1704_v35 = vadd.f32 %v4117_v57, %v1569_v29  ;;  %v1768_v36 = vadd.f32 %v4117_v57, %v1633_v30 }
 0x135   :  { %v1108_v37 = vpop.f32.mrf.mxu0  ;;  %v1364_v38 = vpop.f32.mrf.mxu1 }
 0x136   :  { %3385 = vst [vmem:[#allocation2 + $0x40] sm:$0xff] %v3101_v33   ;;  %3417 = vst [vmem:[#allocation2 + $0x140] sm:$0xff] %v3261_v34   ;;  %v1570_v39 = vmul.f32 %v4111_v53, %v1108_v37  ;;  %v1634_v40 = vmul.f32 %v4111_v53, %v1364_v38  ;;  %v1832_v45 = vmax.f32 %v1704_v35, 0.0  ;;  %v1896_v46 = vmax.f32 %v1768_v36, 0.0 }
 0x137   :  { %v1110_v41 = vpop.f32.mrf.mxu0  ;;  %v1366_v42 = vpop.f32.mrf.mxu1 }
 0x138   :  { %v1705_v43 = vadd.f32 %v4117_v57, %v1570_v39  ;;  %v1769_v44 = vadd.f32 %v4117_v57, %v1634_v40 }
 0x139   :  { %v1113_v47 = vpop.f32.mrf.mxu0  ;;  %v1369_v48 = vpop.f32.mrf.mxu1 }
 0x13a   :  { %v1833_v49 = vmax.f32 %v1705_v43, 0.0  ;;  %v1897_v50 = vmax.f32 %v1769_v44, 0.0  ;;  %v1571_v51 = vmul.f32 %v4111_v53, %v1113_v47  ;;  %v1635_v52 = vmul.f32 %v4111_v53, %v1369_v48 }
 0x13b   :  { %v1115_v54 = vpop.f32.mrf.mxu0  ;;  %v1371_v55 = vpop.f32.mrf.mxu1 }
 0x13c   :  { %v3106_v56 = vpack.c.bf16 %v1833_v49, %v1832_v45  ;;  %v3266_v58 = vpack.c.bf16 %v1897_v50, %v1896_v46  ;;  %v1706_v59 = vadd.f32 %v4117_v57, %v1571_v51  ;;  %v1770_v60 = vadd.f32 %v4117_v57, %v1635_v52 }
 0x13d   :  { %v1116_v61 = vpop.f32.mrf.mxu0  ;;  %v1372_v62 = vpop.f32.mrf.mxu1 }
 0x13e   :  { %3386 = vst [vmem:[#allocation2 + $0x48] sm:$0xff] %v3106_v56   ;;  %3418 = vst [vmem:[#allocation2 + $0x148] sm:$0xff] %v3266_v58   ;;  %v1572_v63 = vmul.f32 %v4111_v53, %v1116_v61  ;;  %v1636_v0 = vmul.f32 %v4111_v53, %v1372_v62  ;;  %v1834_v5 = vmax.f32 %v1706_v59, 0.0  ;;  %v1898_v6 = vmax.f32 %v1770_v60, 0.0 }
 0x13f   :  { %v1118_v1 = vpop.f32.mrf.mxu0  ;;  %v1374_v2 = vpop.f32.mrf.mxu1 }
 0x140   :  { %v1707_v3 = vadd.f32 %v4117_v57, %v1572_v63  ;;  %v1771_v4 = vadd.f32 %v4117_v57, %v1636_v0 }
 0x141   :  { %v1121_v7 = vpop.f32.mrf.mxu0  ;;  %v1377_v8 = vpop.f32.mrf.mxu1 }
 0x142   :  { %v1835_v9 = vmax.f32 %v1707_v3, 0.0  ;;  %v1899_v10 = vmax.f32 %v1771_v4, 0.0  ;;  %v1573_v11 = vmul.f32 %v4111_v53, %v1121_v7  ;;  %v1637_v12 = vmul.f32 %v4111_v53, %v1377_v8 }
 0x143   :  { %v1123_v13 = vpop.f32.mrf.mxu0  ;;  %v1379_v14 = vpop.f32.mrf.mxu1 }
 0x144   :  { %v3111_v15 = vpack.c.bf16 %v1835_v9, %v1834_v5  ;;  %v3271_v16 = vpack.c.bf16 %v1899_v10, %v1898_v6  ;;  %v1708_v17 = vadd.f32 %v4117_v57, %v1573_v11  ;;  %v1772_v18 = vadd.f32 %v4117_v57, %v1637_v12 }
 0x145   :  { %v1124_v19 = vpop.f32.mrf.mxu0  ;;  %v1380_v20 = vpop.f32.mrf.mxu1 }
 0x146   :  { %3387 = vst [vmem:[#allocation2 + $0x50] sm:$0xff] %v3111_v15   ;;  %3419 = vst [vmem:[#allocation2 + $0x150] sm:$0xff] %v3271_v16   ;;  %v1574_v21 = vmul.f32 %v4111_v53, %v1124_v19  ;;  %v1638_v22 = vmul.f32 %v4111_v53, %v1380_v20  ;;  %v1836_v27 = vmax.f32 %v1708_v17, 0.0  ;;  %v1900_v28 = vmax.f32 %v1772_v18, 0.0 }
 0x147   :  { %v1126_v23 = vpop.f32.mrf.mxu0  ;;  %v1382_v24 = vpop.f32.mrf.mxu1 }
 0x148   :  { %v1709_v25 = vadd.f32 %v4117_v57, %v1574_v21  ;;  %v1773_v26 = vadd.f32 %v4117_v57, %v1638_v22 }
 0x149   :  { %v1129_v29 = vpop.f32.mrf.mxu0  ;;  %v1385_v30 = vpop.f32.mrf.mxu1 }
 0x14a   :  { %v1837_v31 = vmax.f32 %v1709_v25, 0.0  ;;  %v1901_v32 = vmax.f32 %v1773_v26, 0.0  ;;  %v1575_v33 = vmul.f32 %v4111_v53, %v1129_v29  ;;  %v1639_v34 = vmul.f32 %v4111_v53, %v1385_v30 }
 0x14b   :  { %v1131_v35 = vpop.f32.mrf.mxu0  ;;  %v1387_v36 = vpop.f32.mrf.mxu1 }
 0x14c   :  { %v3116_v37 = vpack.c.bf16 %v1837_v31, %v1836_v27  ;;  %v3276_v38 = vpack.c.bf16 %v1901_v32, %v1900_v28  ;;  %v1710_v39 = vadd.f32 %v4117_v57, %v1575_v33  ;;  %v1774_v40 = vadd.f32 %v4117_v57, %v1639_v34 }
 0x14d   :  { %v1132_v41 = vpop.f32.mrf.mxu0  ;;  %v1388_v42 = vpop.f32.mrf.mxu1 }
 0x14e   :  { %3388 = vst [vmem:[#allocation2 + $0x58] sm:$0xff] %v3116_v37   ;;  %3420 = vst [vmem:[#allocation2 + $0x158] sm:$0xff] %v3276_v38   ;;  %v1576_v43 = vmul.f32 %v4111_v53, %v1132_v41  ;;  %v1640_v44 = vmul.f32 %v4111_v53, %v1388_v42  ;;  %v1838_v49 = vmax.f32 %v1710_v39, 0.0  ;;  %v1902_v50 = vmax.f32 %v1774_v40, 0.0 }
 0x14f   :  { %v1134_v45 = vpop.f32.mrf.mxu0  ;;  %v1390_v46 = vpop.f32.mrf.mxu1 }
 0x150   :  { %v1711_v47 = vadd.f32 %v4117_v57, %v1576_v43  ;;  %v1775_v48 = vadd.f32 %v4117_v57, %v1640_v44 }
 0x151   :  { %v1137_v51 = vpop.f32.mrf.mxu0  ;;  %v1393_v52 = vpop.f32.mrf.mxu1 }
 0x152   :  { %v1839_v54 = vmax.f32 %v1711_v47, 0.0  ;;  %v1903_v55 = vmax.f32 %v1775_v48, 0.0  ;;  %v1577_v56 = vmul.f32 %v4111_v53, %v1137_v51  ;;  %v1641_v58 = vmul.f32 %v4111_v53, %v1393_v52 }
 0x153   :  { %v1139_v59 = vpop.f32.mrf.mxu0  ;;  %v1395_v60 = vpop.f32.mrf.mxu1 }
 0x154   :  { %v3121_v61 = vpack.c.bf16 %v1839_v54, %v1838_v49  ;;  %v3281_v62 = vpack.c.bf16 %v1903_v55, %v1902_v50  ;;  %v1712_v63 = vadd.f32 %v4117_v57, %v1577_v56  ;;  %v1776_v0 = vadd.f32 %v4117_v57, %v1641_v58 }
 0x155   :  { %v1140_v1 = vpop.f32.mrf.mxu0  ;;  %v1396_v2 = vpop.f32.mrf.mxu1 }
 0x156   :  { %3389 = vst [vmem:[#allocation2 + $0x60] sm:$0xff] %v3121_v61   ;;  %3421 = vst [vmem:[#allocation2 + $0x160] sm:$0xff] %v3281_v62   ;;  %v1578_v3 = vmul.f32 %v4111_v53, %v1140_v1  ;;  %v1642_v4 = vmul.f32 %v4111_v53, %v1396_v2  ;;  %v1840_v9 = vmax.f32 %v1712_v63, 0.0  ;;  %v1904_v10 = vmax.f32 %v1776_v0, 0.0 }
 0x157   :  { %v1142_v5 = vpop.f32.mrf.mxu0  ;;  %v1398_v6 = vpop.f32.mrf.mxu1 }
 0x158   :  { %v1713_v7 = vadd.f32 %v4117_v57, %v1578_v3  ;;  %v1777_v8 = vadd.f32 %v4117_v57, %v1642_v4 }
 0x159   :  { %v1145_v11 = vpop.f32.mrf.mxu0  ;;  %v1401_v12 = vpop.f32.mrf.mxu1 }
 0x15a   :  { %v1841_v13 = vmax.f32 %v1713_v7, 0.0  ;;  %v1905_v14 = vmax.f32 %v1777_v8, 0.0  ;;  %v1579_v15 = vmul.f32 %v4111_v53, %v1145_v11  ;;  %v1643_v16 = vmul.f32 %v4111_v53, %v1401_v12 }
 0x15b   :  { %v1147_v17 = vpop.f32.mrf.mxu0  ;;  %v1403_v18 = vpop.f32.mrf.mxu1 }
 0x15c   :  { %v3126_v19 = vpack.c.bf16 %v1841_v13, %v1840_v9  ;;  %v3286_v20 = vpack.c.bf16 %v1905_v14, %v1904_v10  ;;  %v1714_v21 = vadd.f32 %v4117_v57, %v1579_v15  ;;  %v1778_v22 = vadd.f32 %v4117_v57, %v1643_v16 }
 0x15d   :  { %v1148_v23 = vpop.f32.mrf.mxu0  ;;  %v1404_v24 = vpop.f32.mrf.mxu1 }
 0x15e   :  { %3390 = vst [vmem:[#allocation2 + $0x68] sm:$0xff] %v3126_v19   ;;  %3422 = vst [vmem:[#allocation2 + $0x168] sm:$0xff] %v3286_v20   ;;  %v1580_v25 = vmul.f32 %v4111_v53, %v1148_v23  ;;  %v1644_v26 = vmul.f32 %v4111_v53, %v1404_v24  ;;  %v1842_v31 = vmax.f32 %v1714_v21, 0.0  ;;  %v1906_v32 = vmax.f32 %v1778_v22, 0.0 }
 0x15f   :  { %v1150_v27 = vpop.f32.mrf.mxu0  ;;  %v1406_v28 = vpop.f32.mrf.mxu1 }
 0x160   :  { %v1715_v29 = vadd.f32 %v4117_v57, %v1580_v25  ;;  %v1779_v30 = vadd.f32 %v4117_v57, %v1644_v26 }
 0x161   :  { %v1153_v33 = vpop.f32.mrf.mxu0  ;;  %v1409_v34 = vpop.f32.mrf.mxu1 }
 0x162   :  { %v1843_v35 = vmax.f32 %v1715_v29, 0.0  ;;  %v1907_v36 = vmax.f32 %v1779_v30, 0.0  ;;  %v1581_v37 = vmul.f32 %v4111_v53, %v1153_v33  ;;  %v1645_v38 = vmul.f32 %v4111_v53, %v1409_v34 }
 0x163   :  { %v1155_v39 = vpop.f32.mrf.mxu0  ;;  %v1411_v40 = vpop.f32.mrf.mxu1 }
 0x164   :  { %v3131_v41 = vpack.c.bf16 %v1843_v35, %v1842_v31  ;;  %v3291_v42 = vpack.c.bf16 %v1907_v36, %v1906_v32  ;;  %v1716_v43 = vadd.f32 %v4117_v57, %v1581_v37  ;;  %v1780_v44 = vadd.f32 %v4117_v57, %v1645_v38 }
 0x165   :  { %v1156_v45 = vpop.f32.mrf.mxu0  ;;  %v1412_v46 = vpop.f32.mrf.mxu1 }
 0x166   :  { %3391 = vst [vmem:[#allocation2 + $0x70] sm:$0xff] %v3131_v41   ;;  %3423 = vst [vmem:[#allocation2 + $0x170] sm:$0xff] %v3291_v42   ;;  %v1582_v47 = vmul.f32 %v4111_v53, %v1156_v45  ;;  %v1646_v48 = vmul.f32 %v4111_v53, %v1412_v46  ;;  %v1844_v54 = vmax.f32 %v1716_v43, 0.0  ;;  %v1908_v55 = vmax.f32 %v1780_v44, 0.0 }
 0x167   :  { %v1158_v49 = vpop.f32.mrf.mxu0  ;;  %v1414_v50 = vpop.f32.mrf.mxu1 }
 0x168   :  { %v1717_v51 = vadd.f32 %v4117_v57, %v1582_v47  ;;  %v1781_v52 = vadd.f32 %v4117_v57, %v1646_v48 }
 0x169   :  { %v1161_v56 = vpop.f32.mrf.mxu0  ;;  %v1417_v58 = vpop.f32.mrf.mxu1 }
 0x16a   :  { %v1845_v59 = vmax.f32 %v1717_v51, 0.0  ;;  %v1909_v60 = vmax.f32 %v1781_v52, 0.0  ;;  %v1583_v61 = vmul.f32 %v4111_v53, %v1161_v56  ;;  %v1647_v62 = vmul.f32 %v4111_v53, %v1417_v58 }
 0x16b   :  { %v1163_v63 = vpop.f32.mrf.mxu0  ;;  %v1419_v0 = vpop.f32.mrf.mxu1 }
 0x16c   :  { %v3136_v1 = vpack.c.bf16 %v1845_v59, %v1844_v54  ;;  %v3296_v2 = vpack.c.bf16 %v1909_v60, %v1908_v55  ;;  %v1718_v3 = vadd.f32 %v4117_v57, %v1583_v61  ;;  %v1782_v4 = vadd.f32 %v4117_v57, %v1647_v62 }
 0x16d   :  { %v1164_v5 = vpop.f32.mrf.mxu0  ;;  %v1420_v6 = vpop.f32.mrf.mxu1 }
 0x16e   :  { %3392 = vst [vmem:[#allocation2 + $0x78] sm:$0xff] %v3136_v1   ;;  %3424 = vst [vmem:[#allocation2 + $0x178] sm:$0xff] %v3296_v2   ;;  %v1584_v7 = vmul.f32 %v4111_v53, %v1164_v5  ;;  %v1648_v8 = vmul.f32 %v4111_v53, %v1420_v6  ;;  %v1846_v13 = vmax.f32 %v1718_v3, 0.0  ;;  %v1910_v14 = vmax.f32 %v1782_v4, 0.0  ;;  %v4365_v1 = vld [vmem:[%s4481_s2] ss:$0 sm:$0xff] }
 0x16f   :  { %v1166_v9 = vpop.f32.mrf.mxu0  ;;  %v1422_v10 = vpop.f32.mrf.mxu1  ;;  %s3694_s2 = smov [#allocation2]  }
 0x170   :  { %v1719_v11 = vadd.f32 %v4117_v57, %v1584_v7  ;;  %v1783_v12 = vadd.f32 %v4117_v57, %v1648_v8 }
 0x171   :  { %v1169_v15 = vpop.f32.mrf.mxu0  ;;  %v1425_v16 = vpop.f32.mrf.mxu1 }
 0x172   :  { %v1847_v17 = vmax.f32 %v1719_v11, 0.0  ;;  %v1911_v18 = vmax.f32 %v1783_v12, 0.0  ;;  %v1585_v19 = vmul.f32 %v4111_v53, %v1169_v15  ;;  %v1649_v20 = vmul.f32 %v4111_v53, %v1425_v16 }
 0x173   :  { %v1171_v21 = vpop.f32.mrf.mxu0  ;;  %v1427_v22 = vpop.f32.mrf.mxu1 }
 0x174   :  { %v3141_v23 = vpack.c.bf16 %v1847_v17, %v1846_v13  ;;  %v3301_v24 = vpack.c.bf16 %v1911_v18, %v1910_v14  ;;  %v1720_v25 = vadd.f32 %v4117_v57, %v1585_v19  ;;  %v1784_v26 = vadd.f32 %v4117_v57, %v1649_v20 }
 0x175   :  { %v1172_v27 = vpop.f32.mrf.mxu0  ;;  %v1428_v28 = vpop.f32.mrf.mxu1 }
 0x176   :  { %3393 = vst [vmem:[#allocation2 + $0x80] sm:$0xff] %v3141_v23   ;;  %3425 = vst [vmem:[#allocation2 + $0x180] sm:$0xff] %v3301_v24   ;;  %v1586_v29 = vmul.f32 %v4111_v53, %v1172_v27  ;;  %v1650_v30 = vmul.f32 %v4111_v53, %v1428_v28  ;;  %v1848_v35 = vmax.f32 %v1720_v25, 0.0  ;;  %v1912_v36 = vmax.f32 %v1784_v26, 0.0 }
 0x177   :  { %v1174_v31 = vpop.f32.mrf.mxu0  ;;  %v1430_v32 = vpop.f32.mrf.mxu1 }
 0x178   :  { %v1721_v33 = vadd.f32 %v4117_v57, %v1586_v29  ;;  %v1785_v34 = vadd.f32 %v4117_v57, %v1650_v30 }
 0x179   :  { %v1177_v37 = vpop.f32.mrf.mxu0  ;;  %v1433_v38 = vpop.f32.mrf.mxu1 }
 0x17a   :  { %v1849_v39 = vmax.f32 %v1721_v33, 0.0  ;;  %v1913_v40 = vmax.f32 %v1785_v34, 0.0  ;;  %v1587_v41 = vmul.f32 %v4111_v53, %v1177_v37  ;;  %v1651_v42 = vmul.f32 %v4111_v53, %v1433_v38 }
 0x17b   :  { %v1179_v43 = vpop.f32.mrf.mxu0  ;;  %v1435_v44 = vpop.f32.mrf.mxu1 }
 0x17c   :  { %v3146_v45 = vpack.c.bf16 %v1849_v39, %v1848_v35  ;;  %v3306_v46 = vpack.c.bf16 %v1913_v40, %v1912_v36  ;;  %v1722_v47 = vadd.f32 %v4117_v57, %v1587_v41  ;;  %v1786_v48 = vadd.f32 %v4117_v57, %v1651_v42 }
 0x17d   :  { %v1180_v49 = vpop.f32.mrf.mxu0  ;;  %v1436_v50 = vpop.f32.mrf.mxu1 }
 0x17e   :  { %3394 = vst [vmem:[#allocation2 + $0x88] sm:$0xff] %v3146_v45   ;;  %3426 = vst [vmem:[#allocation2 + $0x188] sm:$0xff] %v3306_v46   ;;  %v1588_v51 = vmul.f32 %v4111_v53, %v1180_v49  ;;  %v1652_v52 = vmul.f32 %v4111_v53, %v1436_v50  ;;  %v1850_v59 = vmax.f32 %v1722_v47, 0.0  ;;  %v1914_v60 = vmax.f32 %v1786_v48, 0.0 }
 0x17f   :  { %v1182_v54 = vpop.f32.mrf.mxu0  ;;  %v1438_v55 = vpop.f32.mrf.mxu1 }
 0x180   :  { %v1723_v56 = vadd.f32 %v4117_v57, %v1588_v51  ;;  %v1787_v58 = vadd.f32 %v4117_v57, %v1652_v52  ;;  %v4372_v57 = vld [vmem:[%s4482_s3] ss:$0 sm:$0xff]  ;;  %s2587_s3 = sshll.u32 %s3694_s2, 4  ;;  %s2588_s3 = int_to_ptr.vmem [resolvable:$true] %s2587_s3 }
 0x181   :  { %v1185_v61 = vpop.f32.mrf.mxu0  ;;  %v1441_v62 = vpop.f32.mrf.mxu1  ;;  %s3670_s28 = scalar_lea.vmem %s2588_s3, 8192  ;;  %p3675_p1 = scmp.lt.s32.totalorder %s2588_s3, %s2588_s3 }
 0x182   :  { %v1851_v63 = vmax.f32 %v1723_v56, 0.0  ;;  %v1915_v0 = vmax.f32 %v1787_v58, 0.0  ;;  %v1589_v2 = vmul.f32 %v4365_v1, %v1185_v61  ;;  %v1653_v53 = vmul.f32 %v4365_v1, %v1441_v62  ;;  %p3671_p0 = scmp.ne.s32.totalorder %s2588_s3, %s3670_s28  ;;  %p3676_p2 = scmp.lt.s32.totalorder %s3670_s28, %s3670_s28 }
 0x183   :  { %v1187_v3 = vpop.f32.mrf.mxu0  ;;  %v1443_v4 = vpop.f32.mrf.mxu1 }
 0x184   :  { %v3151_v5 = vpack.c.bf16 %v1851_v63, %v1850_v59  ;;  %v3311_v6 = vpack.c.bf16 %v1915_v0, %v1914_v60  ;;  %v1724_v7 = vadd.f32 %v4372_v57, %v1589_v2  ;;  %v1788_v8 = vadd.f32 %v4372_v57, %v1653_v53  ;;  %p3677_p3 = por %p3676_p2, %p3675_p1 }
 0x185   :  { %v1188_v9 = vpop.f32.mrf.mxu0  ;;  %v1444_v10 = vpop.f32.mrf.mxu1 }
 0x186   :  { %3395 = vst [vmem:[#allocation2 + $0x90] sm:$0xff] %v3151_v5   ;;  %3427 = vst [vmem:[#allocation2 + $0x190] sm:$0xff] %v3311_v6   ;;  %v1590_v11 = vmul.f32 %v4365_v1, %v1188_v9  ;;  %v1654_v12 = vmul.f32 %v4365_v1, %v1444_v10  ;;  %v1852_v17 = vmax.f32 %v1724_v7, 0.0  ;;  %v1916_v18 = vmax.f32 %v1788_v8, 0.0  ;;  %p3678_p4 = pnand %p3677_p3, %p3671_p0 }
 0x187   :  { %v1190_v13 = vpop.f32.mrf.mxu0  ;;  %v1446_v14 = vpop.f32.mrf.mxu1 }
 0x188   :  { %v1725_v15 = vadd.f32 %v4372_v57, %v1590_v11  ;;  %v1789_v16 = vadd.f32 %v4372_v57, %v1654_v12 }
 0x189   :  { %v1193_v19 = vpop.f32.mrf.mxu0  ;;  %v1449_v20 = vpop.f32.mrf.mxu1 }
 0x18a   :  { %v1853_v21 = vmax.f32 %v1725_v15, 0.0  ;;  %v1917_v22 = vmax.f32 %v1789_v16, 0.0  ;;  %v1591_v23 = vmul.f32 %v4365_v1, %v1193_v19  ;;  %v1655_v24 = vmul.f32 %v4365_v1, %v1449_v20 }
 0x18b   :  { %v1195_v25 = vpop.f32.mrf.mxu0  ;;  %v1451_v26 = vpop.f32.mrf.mxu1 }
 0x18c   :  { %v3156_v27 = vpack.c.bf16 %v1853_v21, %v1852_v17  ;;  %v3316_v28 = vpack.c.bf16 %v1917_v22, %v1916_v18  ;;  %v1726_v29 = vadd.f32 %v4372_v57, %v1591_v23  ;;  %v1790_v30 = vadd.f32 %v4372_v57, %v1655_v24 }
 0x18d   :  { %v1196_v31 = vpop.f32.mrf.mxu0  ;;  %v1452_v32 = vpop.f32.mrf.mxu1 }
 0x18e   :  { %3396 = vst [vmem:[#allocation2 + $0x98] sm:$0xff] %v3156_v27   ;;  %3428 = vst [vmem:[#allocation2 + $0x198] sm:$0xff] %v3316_v28   ;;  %v1592_v33 = vmul.f32 %v4365_v1, %v1196_v31  ;;  %v1656_v34 = vmul.f32 %v4365_v1, %v1452_v32  ;;  %v1854_v39 = vmax.f32 %v1726_v29, 0.0  ;;  %v1918_v40 = vmax.f32 %v1790_v30, 0.0 }
 0x18f   :  { %v1198_v35 = vpop.f32.mrf.mxu0  ;;  %v1454_v36 = vpop.f32.mrf.mxu1 }
 0x190   :  { %v1727_v37 = vadd.f32 %v4372_v57, %v1592_v33  ;;  %v1791_v38 = vadd.f32 %v4372_v57, %v1656_v34 }
 0x191   :  { %v1201_v41 = vpop.f32.mrf.mxu0  ;;  %v1457_v42 = vpop.f32.mrf.mxu1 }
 0x192   :  { %v1855_v43 = vmax.f32 %v1727_v37, 0.0  ;;  %v1919_v44 = vmax.f32 %v1791_v38, 0.0  ;;  %v1593_v45 = vmul.f32 %v4365_v1, %v1201_v41  ;;  %v1657_v46 = vmul.f32 %v4365_v1, %v1457_v42 }
 0x193   :  { %v1203_v47 = vpop.f32.mrf.mxu0  ;;  %v1459_v48 = vpop.f32.mrf.mxu1 }
 0x194   :  { %v3161_v49 = vpack.c.bf16 %v1855_v43, %v1854_v39  ;;  %v3321_v50 = vpack.c.bf16 %v1919_v44, %v1918_v40  ;;  %v1728_v51 = vadd.f32 %v4372_v57, %v1593_v45  ;;  %v1792_v52 = vadd.f32 %v4372_v57, %v1657_v46 }
 0x195   :  { %v1204_v54 = vpop.f32.mrf.mxu0  ;;  %v1460_v55 = vpop.f32.mrf.mxu1 }
 0x196   :  { %3397 = vst [vmem:[#allocation2 + $0xa0] sm:$0xff] %v3161_v49   ;;  %3429 = vst [vmem:[#allocation2 + $0x1a0] sm:$0xff] %v3321_v50   ;;  %v1594_v56 = vmul.f32 %v4365_v1, %v1204_v54  ;;  %v1658_v58 = vmul.f32 %v4365_v1, %v1460_v55  ;;  %v1856_v63 = vmax.f32 %v1728_v51, 0.0  ;;  %v1920_v0 = vmax.f32 %v1792_v52, 0.0 }
 0x197   :  { %v1206_v59 = vpop.f32.mrf.mxu0  ;;  %v1462_v60 = vpop.f32.mrf.mxu1 }
 0x198   :  { %v1729_v61 = vadd.f32 %v4372_v57, %v1594_v56  ;;  %v1793_v62 = vadd.f32 %v4372_v57, %v1658_v58 }
 0x199   :  { %v1209_v2 = vpop.f32.mrf.mxu0  ;;  %v1465_v53 = vpop.f32.mrf.mxu1 }
 0x19a   :  { %v1857_v3 = vmax.f32 %v1729_v61, 0.0  ;;  %v1921_v4 = vmax.f32 %v1793_v62, 0.0  ;;  %v1595_v5 = vmul.f32 %v4365_v1, %v1209_v2  ;;  %v1659_v6 = vmul.f32 %v4365_v1, %v1465_v53 }
 0x19b   :  { %v1211_v7 = vpop.f32.mrf.mxu0  ;;  %v1467_v8 = vpop.f32.mrf.mxu1 }
 0x19c   :  { %v3166_v9 = vpack.c.bf16 %v1857_v3, %v1856_v63  ;;  %v3326_v10 = vpack.c.bf16 %v1921_v4, %v1920_v0  ;;  %v1730_v11 = vadd.f32 %v4372_v57, %v1595_v5  ;;  %v1794_v12 = vadd.f32 %v4372_v57, %v1659_v6 }
 0x19d   :  { %v1212_v13 = vpop.f32.mrf.mxu0  ;;  %v1468_v14 = vpop.f32.mrf.mxu1 }
 0x19e   :  { %3398 = vst [vmem:[#allocation2 + $0xa8] sm:$0xff] %v3166_v9   ;;  %3430 = vst [vmem:[#allocation2 + $0x1a8] sm:$0xff] %v3326_v10   ;;  %v1596_v15 = vmul.f32 %v4365_v1, %v1212_v13  ;;  %v1660_v16 = vmul.f32 %v4365_v1, %v1468_v14  ;;  %v1858_v21 = vmax.f32 %v1730_v11, 0.0  ;;  %v1922_v22 = vmax.f32 %v1794_v12, 0.0 }
 0x19f   :  { %v1214_v17 = vpop.f32.mrf.mxu0  ;;  %v1470_v18 = vpop.f32.mrf.mxu1 }
 0x1a0   :  { %v1731_v19 = vadd.f32 %v4372_v57, %v1596_v15  ;;  %v1795_v20 = vadd.f32 %v4372_v57, %v1660_v16 }
 0x1a1   :  { %v1217_v23 = vpop.f32.mrf.mxu0  ;;  %v1473_v24 = vpop.f32.mrf.mxu1 }
 0x1a2   :  { %v1859_v25 = vmax.f32 %v1731_v19, 0.0  ;;  %v1923_v26 = vmax.f32 %v1795_v20, 0.0  ;;  %v1597_v27 = vmul.f32 %v4365_v1, %v1217_v23  ;;  %v1661_v28 = vmul.f32 %v4365_v1, %v1473_v24 }
 0x1a3   :  { %v1219_v29 = vpop.f32.mrf.mxu0  ;;  %v1475_v30 = vpop.f32.mrf.mxu1 }
 0x1a4   :  { %v3171_v31 = vpack.c.bf16 %v1859_v25, %v1858_v21  ;;  %v3331_v32 = vpack.c.bf16 %v1923_v26, %v1922_v22  ;;  %v1732_v33 = vadd.f32 %v4372_v57, %v1597_v27  ;;  %v1796_v34 = vadd.f32 %v4372_v57, %v1661_v28 }
 0x1a5   :  { %v1220_v35 = vpop.f32.mrf.mxu0  ;;  %v1476_v36 = vpop.f32.mrf.mxu1 }
 0x1a6   :  { %3399 = vst [vmem:[#allocation2 + $0xb0] sm:$0xff] %v3171_v31   ;;  %3431 = vst [vmem:[#allocation2 + $0x1b0] sm:$0xff] %v3331_v32   ;;  %v1598_v37 = vmul.f32 %v4365_v1, %v1220_v35  ;;  %v1662_v38 = vmul.f32 %v4365_v1, %v1476_v36  ;;  %v1860_v43 = vmax.f32 %v1732_v33, 0.0  ;;  %v1924_v44 = vmax.f32 %v1796_v34, 0.0 }
 0x1a7   :  { %v1222_v39 = vpop.f32.mrf.mxu0  ;;  %v1478_v40 = vpop.f32.mrf.mxu1 }
 0x1a8   :  { %v1733_v41 = vadd.f32 %v4372_v57, %v1598_v37  ;;  %v1797_v42 = vadd.f32 %v4372_v57, %v1662_v38 }
 0x1a9   :  { %v1225_v45 = vpop.f32.mrf.mxu0  ;;  %v1481_v46 = vpop.f32.mrf.mxu1 }
 0x1aa   :  { %v1861_v47 = vmax.f32 %v1733_v41, 0.0  ;;  %v1925_v48 = vmax.f32 %v1797_v42, 0.0  ;;  %v1599_v49 = vmul.f32 %v4365_v1, %v1225_v45  ;;  %v1663_v50 = vmul.f32 %v4365_v1, %v1481_v46 }
 0x1ab   :  { %v1227_v51 = vpop.f32.mrf.mxu0  ;;  %v1483_v52 = vpop.f32.mrf.mxu1 }
 0x1ac   :  { %v3176_v54 = vpack.c.bf16 %v1861_v47, %v1860_v43  ;;  %v3336_v55 = vpack.c.bf16 %v1925_v48, %v1924_v44  ;;  %v1734_v56 = vadd.f32 %v4372_v57, %v1599_v49  ;;  %v1798_v58 = vadd.f32 %v4372_v57, %v1663_v50 }
 0x1ad   :  { %v1228_v59 = vpop.f32.mrf.mxu0  ;;  %v1484_v60 = vpop.f32.mrf.mxu1 }
 0x1ae   :  { %3400 = vst [vmem:[#allocation2 + $0xb8] sm:$0xff] %v3176_v54   ;;  %3432 = vst [vmem:[#allocation2 + $0x1b8] sm:$0xff] %v3336_v55   ;;  %v1600_v61 = vmul.f32 %v4365_v1, %v1228_v59  ;;  %v1664_v62 = vmul.f32 %v4365_v1, %v1484_v60  ;;  %v1862_v3 = vmax.f32 %v1734_v56, 0.0  ;;  %v1926_v4 = vmax.f32 %v1798_v58, 0.0 }
 0x1af   :  { %v1230_v63 = vpop.f32.mrf.mxu0  ;;  %v1486_v0 = vpop.f32.mrf.mxu1 }
 0x1b0   :  { %v1735_v2 = vadd.f32 %v4372_v57, %v1600_v61  ;;  %v1799_v53 = vadd.f32 %v4372_v57, %v1664_v62 }
 0x1b1   :  { %v1233_v5 = vpop.f32.mrf.mxu0  ;;  %v1489_v6 = vpop.f32.mrf.mxu1 }
 0x1b2   :  { %v1863_v7 = vmax.f32 %v1735_v2, 0.0  ;;  %v1927_v8 = vmax.f32 %v1799_v53, 0.0  ;;  %v1601_v9 = vmul.f32 %v4365_v1, %v1233_v5  ;;  %v1665_v10 = vmul.f32 %v4365_v1, %v1489_v6 }
 0x1b3   :  { %v1235_v11 = vpop.f32.mrf.mxu0  ;;  %v1491_v12 = vpop.f32.mrf.mxu1 }
 0x1b4   :  { %v3181_v13 = vpack.c.bf16 %v1863_v7, %v1862_v3  ;;  %v3341_v14 = vpack.c.bf16 %v1927_v8, %v1926_v4  ;;  %v1736_v15 = vadd.f32 %v4372_v57, %v1601_v9  ;;  %v1800_v16 = vadd.f32 %v4372_v57, %v1665_v10 }
 0x1b5   :  { %v1236_v17 = vpop.f32.mrf.mxu0  ;;  %v1492_v18 = vpop.f32.mrf.mxu1 }
 0x1b6   :  { %3401 = vst [vmem:[#allocation2 + $0xc0] sm:$0xff] %v3181_v13   ;;  %3433 = vst [vmem:[#allocation2 + $0x1c0] sm:$0xff] %v3341_v14   ;;  %v1602_v19 = vmul.f32 %v4365_v1, %v1236_v17  ;;  %v1666_v20 = vmul.f32 %v4365_v1, %v1492_v18  ;;  %v1864_v25 = vmax.f32 %v1736_v15, 0.0  ;;  %v1928_v26 = vmax.f32 %v1800_v16, 0.0 }
 0x1b7   :  { %v1238_v21 = vpop.f32.mrf.mxu0  ;;  %v1494_v22 = vpop.f32.mrf.mxu1 }
 0x1b8   :  { %v1737_v23 = vadd.f32 %v4372_v57, %v1602_v19  ;;  %v1801_v24 = vadd.f32 %v4372_v57, %v1666_v20 }
 0x1b9   :  { %v1241_v27 = vpop.f32.mrf.mxu0  ;;  %v1497_v28 = vpop.f32.mrf.mxu1 }
 0x1ba   :  { %v1865_v29 = vmax.f32 %v1737_v23, 0.0  ;;  %v1929_v30 = vmax.f32 %v1801_v24, 0.0  ;;  %v1603_v31 = vmul.f32 %v4365_v1, %v1241_v27  ;;  %v1667_v32 = vmul.f32 %v4365_v1, %v1497_v28 }
 0x1bb   :  { %v1243_v33 = vpop.f32.mrf.mxu0  ;;  %v1499_v34 = vpop.f32.mrf.mxu1 }
 0x1bc   :  { %v3186_v35 = vpack.c.bf16 %v1865_v29, %v1864_v25  ;;  %v3346_v36 = vpack.c.bf16 %v1929_v30, %v1928_v26  ;;  %v1738_v37 = vadd.f32 %v4372_v57, %v1603_v31  ;;  %v1802_v38 = vadd.f32 %v4372_v57, %v1667_v32 }
 0x1bd   :  { %v1244_v39 = vpop.f32.mrf.mxu0  ;;  %v1500_v40 = vpop.f32.mrf.mxu1 }
 0x1be   :  { %3402 = vst [vmem:[#allocation2 + $0xc8] sm:$0xff] %v3186_v35   ;;  %3434 = vst [vmem:[#allocation2 + $0x1c8] sm:$0xff] %v3346_v36   ;;  %v1604_v41 = vmul.f32 %v4365_v1, %v1244_v39  ;;  %v1668_v42 = vmul.f32 %v4365_v1, %v1500_v40  ;;  %v1866_v47 = vmax.f32 %v1738_v37, 0.0  ;;  %v1930_v48 = vmax.f32 %v1802_v38, 0.0 }
 0x1bf   :  { %v1246_v43 = vpop.f32.mrf.mxu0  ;;  %v1502_v44 = vpop.f32.mrf.mxu1 }
 0x1c0   :  { %v1739_v45 = vadd.f32 %v4372_v57, %v1604_v41  ;;  %v1803_v46 = vadd.f32 %v4372_v57, %v1668_v42 }
 0x1c1   :  { %v1249_v49 = vpop.f32.mrf.mxu0  ;;  %v1505_v50 = vpop.f32.mrf.mxu1 }
 0x1c2   :  { %v1867_v51 = vmax.f32 %v1739_v45, 0.0  ;;  %v1931_v52 = vmax.f32 %v1803_v46, 0.0  ;;  %v1605_v54 = vmul.f32 %v4365_v1, %v1249_v49  ;;  %v1669_v55 = vmul.f32 %v4365_v1, %v1505_v50 }
 0x1c3   :  { %v1251_v56 = vpop.f32.mrf.mxu0  ;;  %v1507_v58 = vpop.f32.mrf.mxu1 }
 0x1c4   :  { %v3191_v59 = vpack.c.bf16 %v1867_v51, %v1866_v47  ;;  %v3351_v60 = vpack.c.bf16 %v1931_v52, %v1930_v48  ;;  %v1740_v61 = vadd.f32 %v4372_v57, %v1605_v54  ;;  %v1804_v62 = vadd.f32 %v4372_v57, %v1669_v55 }
 0x1c5   :  { %v1252_v63 = vpop.f32.mrf.mxu0  ;;  %v1508_v0 = vpop.f32.mrf.mxu1 }
 0x1c6   :  { %3403 = vst [vmem:[#allocation2 + $0xd0] sm:$0xff] %v3191_v59   ;;  %3435 = vst [vmem:[#allocation2 + $0x1d0] sm:$0xff] %v3351_v60   ;;  %v1606_v2 = vmul.f32 %v4365_v1, %v1252_v63  ;;  %v1670_v53 = vmul.f32 %v4365_v1, %v1508_v0  ;;  %v1868_v7 = vmax.f32 %v1740_v61, 0.0  ;;  %v1932_v8 = vmax.f32 %v1804_v62, 0.0 }
 0x1c7   :  { %v1254_v3 = vpop.f32.mrf.mxu0  ;;  %v1510_v4 = vpop.f32.mrf.mxu1 }
 0x1c8   :  { %v1741_v5 = vadd.f32 %v4372_v57, %v1606_v2  ;;  %v1805_v6 = vadd.f32 %v4372_v57, %v1670_v53 }
 0x1c9   :  { %v1257_v9 = vpop.f32.mrf.mxu0  ;;  %v1513_v10 = vpop.f32.mrf.mxu1 }
 0x1ca   :  { %v1869_v11 = vmax.f32 %v1741_v5, 0.0  ;;  %v1933_v12 = vmax.f32 %v1805_v6, 0.0  ;;  %v1607_v13 = vmul.f32 %v4365_v1, %v1257_v9  ;;  %v1671_v14 = vmul.f32 %v4365_v1, %v1513_v10 }
 0x1cb   :  { %v1259_v15 = vpop.f32.mrf.mxu0  ;;  %v1515_v16 = vpop.f32.mrf.mxu1 }
 0x1cc   :  { %v3196_v17 = vpack.c.bf16 %v1869_v11, %v1868_v7  ;;  %v3356_v18 = vpack.c.bf16 %v1933_v12, %v1932_v8  ;;  %v1742_v19 = vadd.f32 %v4372_v57, %v1607_v13  ;;  %v1806_v20 = vadd.f32 %v4372_v57, %v1671_v14 }
 0x1cd   :  { %v1260_v21 = vpop.f32.mrf.mxu0  ;;  %v1516_v22 = vpop.f32.mrf.mxu1 }
 0x1ce   :  { %3404 = vst [vmem:[#allocation2 + $0xd8] sm:$0xff] %v3196_v17   ;;  %3436 = vst [vmem:[#allocation2 + $0x1d8] sm:$0xff] %v3356_v18   ;;  %v1608_v23 = vmul.f32 %v4365_v1, %v1260_v21  ;;  %v1672_v24 = vmul.f32 %v4365_v1, %v1516_v22  ;;  %v1870_v29 = vmax.f32 %v1742_v19, 0.0  ;;  %v1934_v30 = vmax.f32 %v1806_v20, 0.0 }
 0x1cf   :  { %v1262_v25 = vpop.f32.mrf.mxu0  ;;  %v1518_v26 = vpop.f32.mrf.mxu1 }
 0x1d0   :  { %v1743_v27 = vadd.f32 %v4372_v57, %v1608_v23  ;;  %v1807_v28 = vadd.f32 %v4372_v57, %v1672_v24 }
 0x1d1   :  { %v1265_v31 = vpop.f32.mrf.mxu0  ;;  %v1521_v32 = vpop.f32.mrf.mxu1 }
 0x1d2   :  { %v1871_v33 = vmax.f32 %v1743_v27, 0.0  ;;  %v1935_v34 = vmax.f32 %v1807_v28, 0.0  ;;  %v1609_v35 = vmul.f32 %v4365_v1, %v1265_v31  ;;  %v1673_v36 = vmul.f32 %v4365_v1, %v1521_v32 }
 0x1d3   :  { %v1267_v37 = vpop.f32.mrf.mxu0  ;;  %v1523_v38 = vpop.f32.mrf.mxu1 }
 0x1d4   :  { %v3201_v39 = vpack.c.bf16 %v1871_v33, %v1870_v29  ;;  %v3361_v40 = vpack.c.bf16 %v1935_v34, %v1934_v30  ;;  %v1744_v41 = vadd.f32 %v4372_v57, %v1609_v35  ;;  %v1808_v42 = vadd.f32 %v4372_v57, %v1673_v36 }
 0x1d5   :  { %v1268_v43 = vpop.f32.mrf.mxu0  ;;  %v1524_v44 = vpop.f32.mrf.mxu1 }
 0x1d6   :  { %3405 = vst [vmem:[#allocation2 + $0xe0] sm:$0xff] %v3201_v39   ;;  %3437 = vst [vmem:[#allocation2 + $0x1e0] sm:$0xff] %v3361_v40   ;;  %v1610_v45 = vmul.f32 %v4365_v1, %v1268_v43  ;;  %v1674_v46 = vmul.f32 %v4365_v1, %v1524_v44  ;;  %v1872_v51 = vmax.f32 %v1744_v41, 0.0  ;;  %v1936_v52 = vmax.f32 %v1808_v42, 0.0 }
 0x1d7   :  { %v1270_v47 = vpop.f32.mrf.mxu0  ;;  %v1526_v48 = vpop.f32.mrf.mxu1 }
 0x1d8   :  { %v1745_v49 = vadd.f32 %v4372_v57, %v1610_v45  ;;  %v1809_v50 = vadd.f32 %v4372_v57, %v1674_v46 }
 0x1d9   :  { %v1273_v54 = vpop.f32.mrf.mxu0  ;;  %v1529_v55 = vpop.f32.mrf.mxu1 }
 0x1da   :  { %v1873_v56 = vmax.f32 %v1745_v49, 0.0  ;;  %v1937_v58 = vmax.f32 %v1809_v50, 0.0  ;;  %v1611_v59 = vmul.f32 %v4365_v1, %v1273_v54  ;;  %v1675_v60 = vmul.f32 %v4365_v1, %v1529_v55 }
 0x1db   :  { %v1275_v61 = vpop.f32.mrf.mxu0  ;;  %v1531_v62 = vpop.f32.mrf.mxu1 }
 0x1dc   :  { %v3206_v63 = vpack.c.bf16 %v1873_v56, %v1872_v51  ;;  %v3366_v0 = vpack.c.bf16 %v1937_v58, %v1936_v52  ;;  %v1746_v2 = vadd.f32 %v4372_v57, %v1611_v59  ;;  %v1810_v53 = vadd.f32 %v4372_v57, %v1675_v60 }
 0x1dd   :  { %v1276_v3 = vpop.f32.mrf.mxu0  ;;  %v1532_v4 = vpop.f32.mrf.mxu1 }
 0x1de   :  { %3406 = vst [vmem:[#allocation2 + $0xe8] sm:$0xff] %v3206_v63   ;;  %3438 = vst [vmem:[#allocation2 + $0x1e8] sm:$0xff] %v3366_v0   ;;  %v1612_v5 = vmul.f32 %v4365_v1, %v1276_v3  ;;  %v1676_v6 = vmul.f32 %v4365_v1, %v1532_v4  ;;  %v1874_v11 = vmax.f32 %v1746_v2, 0.0  ;;  %v1938_v12 = vmax.f32 %v1810_v53, 0.0 }
 0x1df   :  { %v1278_v7 = vpop.f32.mrf.mxu0  ;;  %v1534_v8 = vpop.f32.mrf.mxu1 }
 0x1e0   :  { %v1747_v9 = vadd.f32 %v4372_v57, %v1612_v5  ;;  %v1811_v10 = vadd.f32 %v4372_v57, %v1676_v6 }
 0x1e1   :  { %v1281_v13 = vpop.f32.mrf.mxu0  ;;  %v1537_v14 = vpop.f32.mrf.mxu1 }
 0x1e2   :  { %v1875_v15 = vmax.f32 %v1747_v9, 0.0  ;;  %v1939_v16 = vmax.f32 %v1811_v10, 0.0  ;;  %v1613_v17 = vmul.f32 %v4365_v1, %v1281_v13  ;;  %v1677_v18 = vmul.f32 %v4365_v1, %v1537_v14 }
 0x1e3   :  { %v1283_v19 = vpop.f32.mrf.mxu0  ;;  %v1539_v20 = vpop.f32.mrf.mxu1 }
 0x1e4   :  { %v3211_v21 = vpack.c.bf16 %v1875_v15, %v1874_v11  ;;  %v3371_v22 = vpack.c.bf16 %v1939_v16, %v1938_v12  ;;  %v1748_v25 = vadd.f32 %v4372_v57, %v1613_v17  ;;  %v1812_v26 = vadd.f32 %v4372_v57, %v1677_v18 }
 0x1e5   :  { %v1284_v23 = vpop.f32.mrf.mxu0  ;;  %v1540_v24 = vpop.f32.mrf.mxu1 }
 0x1e6   :  { %3407 = vst [vmem:[#allocation2 + $0xf0] sm:$0xff] %v3211_v21   ;;  %3439 = vst [vmem:[#allocation2 + $0x1f0] sm:$0xff] %v3371_v22   ;;  %v1614_v27 = vmul.f32 %v4365_v1, %v1284_v23  ;;  %v1678_v28 = vmul.f32 %v4365_v1, %v1540_v24  ;;  %v1876_v33 = vmax.f32 %v1748_v25, 0.0  ;;  %v1940_v34 = vmax.f32 %v1812_v26, 0.0 }
 0x1e7   :  { %v1286_v29 = vpop.f32.mrf.mxu0  ;;  %v1542_v30 = vpop.f32.mrf.mxu1 }
 0x1e8   :  { %v1749_v31 = vadd.f32 %v4372_v57, %v1614_v27  ;;  %v1813_v32 = vadd.f32 %v4372_v57, %v1678_v28 }
 0x1ea   :  { %v1877_v35 = vmax.f32 %v1749_v31, 0.0  ;;  %v1941_v36 = vmax.f32 %v1813_v32, 0.0 }
 0x1ec   :  { %v3216_v37 = vpack.c.bf16 %v1877_v35, %v1876_v33  ;;  %v3376_v38 = vpack.c.bf16 %v1941_v36, %v1940_v34 }
 0x1ee   :  { %3408 = vst [vmem:[#allocation2 + $0xf8] sm:$0xff] %v3216_v37   ;;  %3440 = vst [vmem:[#allocation2 + $0x1f8] sm:$0xff] %v3376_v38  }
 0x1ef   :  { %3681 = shalt.err (!%p3678_p4)
}
 0x1f0   :  { %s3695_s29 = smov 64   ;;  %s3696_s30 = smov 4  }
 0x1f1   :  { %2593 = dma.vmem_to_hbm [thread:$0]  %s2588_s3, 8192, %s4483_s4, [#allocation3], %s3695_s29, %s3695_s29, %s3696_s30  }
 0x1f2   :  { %3690 = dma.done.wait [#allocation3], 8192  }
 0x1f3   :  { %3691 = vsyncadd [#allocation3], 4294959104 }
 0x1f4   :  { %2597 = vsyncpa [#allocation3], 1 }

</bundles_post_ra>
